<compile_context>
chip_gen: v6e
topology: v6e:2x2x1
jax: 0.10.0
libtpu: 0.0.40
codegen_flags: <defaults>
</compile_context>

<pallas_src>
import numpy as np
import jax
import jax.numpy as jnp
from jax.experimental import pallas as pl
from jax.experimental.pallas import tpu as pltpu


def _round_up(x, m):
    return ((x + m - 1) // m) * m


def _pick_row_tile(n, cap=512):
    """Row (sublane) tile: big enough to amortize per-step overhead, small
    enough to give >=4 grid steps for dual-TC sharding, no dead rows for
    small batches."""
    n8 = _round_up(max(int(n), 1), 8)
    if n8 <= cap:
        return n8                       # single right-sized block
    if pl.cdiv(n8, cap) >= 4:
        return cap                      # big batches: largest tile
    return max(cap // 2, 256)           # keep >=4 steps (v7x), still >=256


# ------------------------------ Pallas kernel -------------------------------
def _make_atom_encoder_kernel(nc, has_cont):
    """nc = number of categorical features (static)."""

    def kernel(*refs):
        if has_cont:
            (xcat_ref, sig_ref, xcont_ref, wemb_ref, wsig_ref,
             wcx_ref, wcc_ref, bc_ref, o_ref) = refs
        else:
            xcat_ref, sig_ref, wemb_ref, wsig_ref, o_ref = refs

        tm = xcat_ref.shape[0]
        k = wemb_ref.shape[0]                        # sum(cat_dims) + 1 (bias row)

        # On-the-fly one-hot over the concatenated tables (never touches HBM).
        # ids already carry the per-feature row offsets (added in the wrapper).
        ids = xcat_ref[...]                          # (tm, nc) int32
        col = jax.lax.broadcasted_iota(jnp.int32, (tm, k), 1)
        hit = col == ids[:, 0:1]
        for i in range(1, nc):
            hit = jnp.logical_or(hit, col == ids[:, i:i + 1])
        hit = jnp.logical_or(hit, col == k - 1)      # constant-1 bias column
        onehot = jnp.where(hit, 1.0, 0.0).astype(jnp.bfloat16)

        # x = sum_i emb_i[id_i] + b_sigma  (bias folded into wemb's last row)
        #   + sigma_emb @ W_sigma^T
        x = jnp.dot(onehot, wemb_ref[...], preferred_element_type=jnp.float32)
        x = x + jnp.dot(sig_ref[...].astype(jnp.bfloat16), wsig_ref[...],
                        preferred_element_type=jnp.float32)

        if has_cont:
            # torch.cat([x, x_cont]) @ W_cont^T == x @ Wcx + x_cont @ Wcc
            x = (jnp.dot(x.astype(jnp.bfloat16), wcx_ref[...],
                         preferred_element_type=jnp.float32)
                 + jnp.dot(xcont_ref[...].astype(jnp.bfloat16), wcc_ref[...],
                           preferred_element_type=jnp.float32)
                 + bc_ref[...])

        o_ref[...] = x.astype(o_ref.dtype)

    return kernel


# --------------------------- one-time weight prep ----------------------------
def prepare_atom_encoder_params(params):
    """Hoists all weight preprocessing out of the per-call forward path."""
    emb_tables = params['emb']
    cat_dims = [int(t.shape[0]) for t in emb_tables]
    emb_dim = int(emb_tables[0].shape[1])

    offsets = np.concatenate([[0], np.cumsum(cat_dims[:-1])]).astype(np.int32)
    prepped = {
        'id_offset': jnp.asarray(offsets, jnp.int32)[None, :],          # (1, nc)
        'id_max': jnp.asarray([d - 1 for d in cat_dims], jnp.int32)[None, :],
        # Row-stacked embedding tables + b_sigma as a final "bias row".
        'w_emb': jnp.concatenate(
            [t.astype(jnp.float32) for t in emb_tables]
            + [params['b_sigma'].astype(jnp.float32).reshape(1, emb_dim)],
            axis=0).astype(jnp.bfloat16),                               # (total+1, E)
        'w_sigma': params['w_sigma'].astype(jnp.float32).T.astype(jnp.bfloat16),
    }
    if 'w_cont' in params:
        wcT = params['w_cont'].astype(jnp.float32).T                    # (E+cont, E)
        prepped['w_cont_x'] = wcT[:emb_dim].astype(jnp.bfloat16)        # (E, E)
        prepped['w_cont_c'] = wcT[emb_dim:].astype(jnp.bfloat16)        # (cont, E)
        prepped['b_cont'] = params['b_cont'].astype(jnp.float32).reshape(1, emb_dim)
    return prepped


# ------------------------------ forward wrapper -------------------------------
def atom_encoder_forward(prepped, *, x_cat, sigma_emb, x_cont=None,
                         row_tile=None, out_dtype=jnp.float32):
    n, nc = x_cat.shape
    emb_dim = prepped['w_emb'].shape[1]
    total1 = prepped['w_emb'].shape[0]             # sum(cat_dims) + 1
    sd = sigma_emb.shape[1]
    has_cont = 'w_cont_x' in prepped
    assert has_cont == (x_cont is not None)

    if row_tile is None:
        row_tile = _pick_row_tile(n)
    grid = (pl.cdiv(n, row_tile),)

    # Clamp ids into their table range and add the per-feature row offsets
    # (single fused elementwise op on a tiny (n, nc) int array).
    ids = (jnp.minimum(jnp.maximum(x_cat.astype(jnp.int32), 0), prepped['id_max'])
           + prepped['id_offset'])

    ins = [ids, sigma_emb]
    in_specs = [
        pl.BlockSpec((row_tile, nc), lambda i: (i, 0)),
        pl.BlockSpec((row_tile, sd), lambda i: (i, 0)),
    ]
    cont = 0
    if has_cont:
        cont = x_cont.shape[1]
        ins.append(x_cont)
        in_specs.append(pl.BlockSpec((row_tile, cont), lambda i: (i, 0)))

    # Weights: constant index_map -> stay VMEM-resident across the row grid.
    ins += [prepped['w_emb'], prepped['w_sigma']]
    in_specs += [
        pl.BlockSpec((total1, emb_dim), lambda i: (0, 0)),
        pl.BlockSpec((sd, emb_dim), lambda i: (0, 0)),
    ]
    if has_cont:
        ins += [prepped['w_cont_x'], prepped['w_cont_c'], prepped['b_cont']]
        in_specs += [
            pl.BlockSpec((emb_dim, emb_dim), lambda i: (0, 0)),
            pl.BlockSpec((cont, emb_dim), lambda i: (0, 0)),
            pl.BlockSpec((1, emb_dim), lambda i: (0, 0)),
        ]

    # Tight VMEM budget: double-buffered activation/output blocks + weights,
    # with generous headroom; clamped to 32 MiB (safe on v7x's 64 MiB VMEM).
    blk_bytes = row_tile * 4 * (nc + sd + cont + emb_dim)
    w_bytes = (total1 + sd) * emb_dim * 2
    if has_cont:
        w_bytes += (emb_dim + cont) * emb_dim * 2 + emb_dim * 4
    vmem_limit = int(min(32 << 20, max(8 << 20, 8 * 2 * (blk_bytes + w_bytes))))

    return pl.pallas_call(
        _make_atom_encoder_kernel(nc, has_cont),
        out_shape=jax.ShapeDtypeStruct((n, emb_dim), out_dtype),
        grid=grid,
        in_specs=in_specs,
        out_specs=pl.BlockSpec((row_tile, emb_dim), lambda i: (i, 0)),
        compiler_params=pltpu.CompilerParams(
            dimension_semantics=("parallel",),
            vmem_limit_bytes=vmem_limit),
    )(*ins)


# ------------------------- pure-JAX reference + init -------------------------
def atom_encoder_ref(params, x_cat, sigma_emb, x_cont=None):
    x = sum(params['emb'][i][x_cat[:, i]] for i in range(len(params['emb'])))
    x = x + sigma_emb @ params['w_sigma'].T + params['b_sigma']
    if x_cont is not None:
        x = jnp.concatenate([x, x_cont], axis=1) @ params['w_cont'].T + params['b_cont']
    return x


def _linear_init(key, out_dim, in_dim):
    k1, k2 = jax.random.split(key)
    bound = 1.0 / (in_dim ** 0.5)
    w = jax.random.uniform(k1, (out_dim, in_dim), jnp.float32, -bound, bound)
    b = jax.random.uniform(k2, (out_dim,), jnp.float32, -bound, bound)
    return w, b


def init_atom_encoder_params(key, emb_dim, cat_dims, cont_feats, sigma_embed_dim):
    keys = jax.random.split(key, len(cat_dims) + 2)
    glorot = jax.nn.initializers.glorot_uniform()
    emb = [glorot(keys[i], (d, emb_dim), jnp.float32) for i, d in enumerate(cat_dims)]
    w_sigma, b_sigma = _linear_init(keys[len(cat_dims)], emb_dim, sigma_embed_dim)
    p = {'emb': emb, 'w_sigma': w_sigma, 'b_sigma': b_sigma}
    if cont_feats:
        w_cont, b_cont = _linear_init(keys[len(cat_dims) + 1], emb_dim,
                                      cont_feats + emb_dim)
        p['w_cont'] = w_cont
        p['b_cont'] = b_cont
    return p


# ---------------------------------- main -------------------------------------
if __name__ == "__main__":
    key = jax.random.PRNGKey(0)

    # config A: emb_dim=128 (lane dense), continuous features, n=1000 -> 4 grid steps
    emb_dim, cat_dims, cont_feats, sigma_dim, n = 128, (5, 7), 3, 32, 1000
    kp, kx, ks, kc, key = jax.random.split(key, 5)
    params = init_atom_encoder_params(kp, emb_dim, cat_dims, cont_feats, sigma_dim)
    x_cat = jnp.stack([jax.random.randint(jax.random.fold_in(kx, i), (n,), 0, d)
                       for i, d in enumerate(cat_dims)], axis=1).astype(jnp.int32)
    sigma_emb = jax.random.normal(ks, (n, sigma_dim), jnp.float32)
    x_cont = jax.random.normal(kc, (n, cont_feats), jnp.float32)

    prepped = prepare_atom_encoder_params(params)        # one-time weight prep
    fwd = jax.jit(lambda pp, xc, se, xco: atom_encoder_forward(
        pp, x_cat=xc, sigma_emb=se, x_cont=xco))
    out = jax.block_until_ready(fwd(prepped, x_cat, sigma_emb, x_cont))
    ref = atom_encoder_ref(params, x_cat, sigma_emb, x_cont)
    assert out.shape == (n, emb_dim)
    err = float(jnp.max(jnp.abs(out - ref)) / (1.0 + jnp.max(jnp.abs(ref))))
    assert err < 3e-2, f"config A mismatch: {err}"        # bf16 MXU operands

    # config B: emb_dim=64 (< 128 lanes, no output padding), no cont feats,
    # n=300 (partial block, single right-sized row tile)
    emb_dim2, cat_dims2, sigma_dim2, n2 = 64, (4, 6, 9), 16, 300
    kp2, kx2, ks2, _ = jax.random.split(key, 4)
    params2 = init_atom_encoder_params(kp2, emb_dim2, cat_dims2, 0, sigma_dim2)
    x_cat2 = jnp.stack([jax.random.randint(jax.random.fold_in(kx2, i), (n2,), 0, d)
                        for i, d in enumerate(cat_dims2)], axis=1).astype(jnp.int32)
    sigma_emb2 = jax.random.normal(ks2, (n2, sigma_dim2), jnp.float32)

    prepped2 = prepare_atom_encoder_params(params2)
    fwd2 = jax.jit(lambda pp, xc, se: atom_encoder_forward(pp, x_cat=xc, sigma_emb=se))
    out2 = jax.block_until_ready(fwd2(prepped2, x_cat2, sigma_emb2))
    ref2 = atom_encoder_ref(params2, x_cat2, sigma_emb2)
    assert out2.shape == (n2, emb_dim2)
    err2 = float(jnp.max(jnp.abs(out2 - ref2)) / (1.0 + jnp.max(jnp.abs(ref2))))
    assert err2 < 3e-2, f"config B mismatch: {err2}"

    print("KERNEL_OK")
</pallas_src>

<mosaic_0001>
module attributes {stable_mosaic.version = 11 : i64} {
  func.func @kernel(%arg0: i32, %arg1: memref<256x2xi32, #tpu.memory_space<vmem>>, %arg2: memref<256x32xf32, #tpu.memory_space<vmem>>, %arg3: memref<256x3xf32, #tpu.memory_space<vmem>>, %arg4: memref<13x128xbf16, #tpu.memory_space<vmem>>, %arg5: memref<32x128xbf16, #tpu.memory_space<vmem>>, %arg6: memref<128x128xbf16, #tpu.memory_space<vmem>>, %arg7: memref<3x128xbf16, #tpu.memory_space<vmem>>, %arg8: memref<1x128xf32, #tpu.memory_space<vmem>>, %arg9: memref<256x128xf32, #tpu.memory_space<vmem>>) attributes {dimension_semantics = [#tpu.dimension_semantics<parallel>], iteration_bounds = array<i64: 4>, scalar_prefetch = 0 : i64, scratch_operands = 0 : i64, tpu.core_type = #tpu.core_type<tc>, window_params = [{transform_indices = @transform_0, window_bounds = array<i64: 256, 2>}, {transform_indices = @transform_1, window_bounds = array<i64: 256, 32>}, {transform_indices = @transform_2, window_bounds = array<i64: 256, 3>}, {pipeline_mode = #tpu.pipeline_mode<synchronous>, transform_indices = @transform_3, window_bounds = array<i64: 13, 128>}, {pipeline_mode = #tpu.pipeline_mode<synchronous>, transform_indices = @transform_4, window_bounds = array<i64: 32, 128>}, {pipeline_mode = #tpu.pipeline_mode<synchronous>, transform_indices = @transform_5, window_bounds = array<i64: 128, 128>}, {pipeline_mode = #tpu.pipeline_mode<synchronous>, transform_indices = @transform_6, window_bounds = array<i64: 3, 128>}, {pipeline_mode = #tpu.pipeline_mode<synchronous>, transform_indices = @transform_7, window_bounds = array<i64: 1, 128>}, {transform_indices = @transform_8, window_bounds = array<i64: 256, 128>}]} {
    %c0 = arith.constant 0 : index
    %c0_0 = arith.constant 0 : index
    %0 = vector.load %arg1[%c0, %c0_0] : memref<256x2xi32, #tpu.memory_space<vmem>>, vector<256x2xi32>
    %1 = tpu.iota {dimensions = array<i32: 1>} : vector<256x13xi32>
    %2 = vector.extract_strided_slice %0 {offsets = [0, 0], sizes = [256, 1], strides = [1, 1]} : vector<256x2xi32> to vector<256x1xi32>
    %3 = vector.broadcast %2 : vector<256x1xi32> to vector<256x13xi32>
    %4 = arith.cmpi eq, %1, %3 : vector<256x13xi32>
    %5 = vector.extract_strided_slice %0 {offsets = [0, 1], sizes = [256, 1], strides = [1, 1]} : vector<256x2xi32> to vector<256x1xi32>
    %6 = vector.broadcast %5 : vector<256x1xi32> to vector<256x13xi32>
    %7 = arith.cmpi eq, %1, %6 : vector<256x13xi32>
    %8 = arith.ori %4, %7 : vector<256x13xi1>
    %c12_i32 = arith.constant 12 : i32
    %9 = vector.broadcast %c12_i32 : i32 to vector<256x13xi32>
    %10 = arith.cmpi eq, %1, %9 : vector<256x13xi32>
    %11 = arith.ori %8, %10 : vector<256x13xi1>
    %cst = arith.constant 1.000000e+00 : f32
    %cst_1 = arith.constant 0.000000e+00 : f32
    %12 = vector.broadcast %cst : f32 to vector<256x13xf32>
    %13 = vector.broadcast %cst_1 : f32 to vector<256x13xf32>
    %14 = arith.select %11, %12, %13 : vector<256x13xi1>, vector<256x13xf32>
    %15 = arith.truncf %14 : vector<256x13xf32> to vector<256x13xbf16>
    %c0_2 = arith.constant 0 : index
    %c0_3 = arith.constant 0 : index
    %16 = vector.load %arg4[%c0_2, %c0_3] : memref<13x128xbf16, #tpu.memory_space<vmem>>, vector<13x128xbf16>
    %cst_4 = arith.constant dense<0.000000e+00> : vector<256x128xf32>
    %17 = tpu.matmul %15, %16, %cst_4 {dimension_numbers = #tpu.dot_dimension_numbers<[1], [0], [0], [1], [0, 0, 1, 1], [], []>} : vector<256x13xbf16>, vector<13x128xbf16>, vector<256x128xf32> -> vector<256x128xf32>
    %c0_5 = arith.constant 0 : index
    %c0_6 = arith.constant 0 : index
    %18 = vector.load %arg2[%c0_5, %c0_6] : memref<256x32xf32, #tpu.memory_space<vmem>>, vector<256x32xf32>
    %19 = arith.truncf %18 : vector<256x32xf32> to vector<256x32xbf16>
    %c0_7 = arith.constant 0 : index
    %c0_8 = arith.constant 0 : index
    %20 = vector.load %arg5[%c0_7, %c0_8] : memref<32x128xbf16, #tpu.memory_space<vmem>>, vector<32x128xbf16>
    %cst_9 = arith.constant dense<0.000000e+00> : vector<256x128xf32>
    %21 = tpu.matmul %19, %20, %cst_9 {dimension_numbers = #tpu.dot_dimension_numbers<[1], [0], [0], [1], [0, 0, 1, 1], [], []>} : vector<256x32xbf16>, vector<32x128xbf16>, vector<256x128xf32> -> vector<256x128xf32>
    %22 = arith.addf %17, %21 : vector<256x128xf32>
    %23 = arith.truncf %22 : vector<256x128xf32> to vector<256x128xbf16>
    %c0_10 = arith.constant 0 : index
    %c0_11 = arith.constant 0 : index
    %24 = vector.load %arg6[%c0_10, %c0_11] : memref<128x128xbf16, #tpu.memory_space<vmem>>, vector<128x128xbf16>
    %cst_12 = arith.constant dense<0.000000e+00> : vector<256x128xf32>
    %25 = tpu.matmul %23, %24, %cst_12 {dimension_numbers = #tpu.dot_dimension_numbers<[1], [0], [0], [1], [0, 0, 1, 1], [], []>} : vector<256x128xbf16>, vector<128x128xbf16>, vector<256x128xf32> -> vector<256x128xf32>
    %c0_13 = arith.constant 0 : index
    %c0_14 = arith.constant 0 : index
    %26 = vector.load %arg3[%c0_13, %c0_14] : memref<256x3xf32, #tpu.memory_space<vmem>>, vector<256x3xf32>
    %27 = arith.truncf %26 : vector<256x3xf32> to vector<256x3xbf16>
    %c0_15 = arith.constant 0 : index
    %c0_16 = arith.constant 0 : index
    %28 = vector.load %arg7[%c0_15, %c0_16] : memref<3x128xbf16, #tpu.memory_space<vmem>>, vector<3x128xbf16>
    %cst_17 = arith.constant dense<0.000000e+00> : vector<256x128xf32>
    %29 = tpu.matmul %27, %28, %cst_17 {dimension_numbers = #tpu.dot_dimension_numbers<[1], [0], [0], [1], [0, 0, 1, 1], [], []>} : vector<256x3xbf16>, vector<3x128xbf16>, vector<256x128xf32> -> vector<256x128xf32>
    %30 = arith.addf %25, %29 : vector<256x128xf32>
    %c0_18 = arith.constant 0 : index
    %c0_19 = arith.constant 0 : index
    %31 = vector.load %arg8[%c0_18, %c0_19] : memref<1x128xf32, #tpu.memory_space<vmem>>, vector<1x128xf32>
    %32 = vector.broadcast %31 : vector<1x128xf32> to vector<256x128xf32>
    %33 = arith.addf %30, %32 : vector<256x128xf32>
    %c0_20 = arith.constant 0 : index
    %c0_21 = arith.constant 0 : index
    %34 = vector.load %arg9[%c0_20, %c0_21] : memref<256x128xf32, #tpu.memory_space<vmem>>, vector<256x128xf32>
    tpu.vector_store %arg9[%c0_20, %c0_21], %33 {strides = array<i32>} : memref<256x128xf32, #tpu.memory_space<vmem>>, vector<256x128xf32>,
    return
  }
  func.func @transform_0(%arg0: i32) -> (i32, i32) {
    %c0_i32 = arith.constant 0 : i32
    %c0_i32_0 = arith.constant 0 : i32
    return %arg0, %c0_i32 : i32, i32
  }
  func.func @transform_1(%arg0: i32) -> (i32, i32) {
    %c0_i32 = arith.constant 0 : i32
    %c0_i32_0 = arith.constant 0 : i32
    return %arg0, %c0_i32 : i32, i32
  }
  func.func @transform_2(%arg0: i32) -> (i32, i32) {
    %c0_i32 = arith.constant 0 : i32
    %c0_i32_0 = arith.constant 0 : i32
    return %arg0, %c0_i32 : i32, i32
  }
  func.func @transform_3(%arg0: i32) -> (i32, i32) {
    %c0_i32 = arith.constant 0 : i32
    %c0_i32_0 = arith.constant 0 : i32
    %c0_i32_1 = arith.constant 0 : i32
    return %c0_i32, %c0_i32_0 : i32, i32
  }
  func.func @transform_4(%arg0: i32) -> (i32, i32) {
    %c0_i32 = arith.constant 0 : i32
    %c0_i32_0 = arith.constant 0 : i32
    %c0_i32_1 = arith.constant 0 : i32
    return %c0_i32, %c0_i32_0 : i32, i32
  }
  func.func @transform_5(%arg0: i32) -> (i32, i32) {
    %c0_i32 = arith.constant 0 : i32
    %c0_i32_0 = arith.constant 0 : i32
    %c0_i32_1 = arith.constant 0 : i32
    return %c0_i32, %c0_i32_0 : i32, i32
  }
  func.func @transform_6(%arg0: i32) -> (i32, i32) {
    %c0_i32 = arith.constant 0 : i32
    %c0_i32_0 = arith.constant 0 : i32
    %c0_i32_1 = arith.constant 0 : i32
    return %c0_i32, %c0_i32_0 : i32, i32
  }
  func.func @transform_7(%arg0: i32) -> (i32, i32) {
    %c0_i32 = arith.constant 0 : i32
    %c0_i32_0 = arith.constant 0 : i32
    %c0_i32_1 = arith.constant 0 : i32
    return %c0_i32, %c0_i32_0 : i32, i32
  }
  func.func @transform_8(%arg0: i32) -> (i32, i32) {
    %c0_i32 = arith.constant 0 : i32
    %c0_i32_0 = arith.constant 0 : i32
    return %arg0, %c0_i32 : i32, i32
  }
}

</mosaic_0001>

<bundles_post_ra>
// kernel: _lambda_.1
= control target key start
LH: loop header
LB: loop body
LE: loop exit
PB: predicated region body
PF: predicated region fallthrough
CT: control target
= control target key end

     0   :  { %13 = vsyncpa [#allocation3], 0  ;;  %s3177_s0 = inlined_call_operand.vmem [shape: s32[1000,2], index: 0, kind: input, shape index: {}]   ;;  %s3178_s1 = inlined_call_operand.vmem [shape: f32[1000,32], index: 1, kind: input, shape index: {}]   ;;  %s3179_s2 = inlined_call_operand.vmem [shape: f32[1000,3], index: 2, kind: input, shape index: {}]   ;;  %s3180_s3 = inlined_call_operand.vmem [shape: bf16[13,128], index: 3, kind: input, shape index: {}]   ;;  %s3181_s4 = inlined_call_operand.vmem [shape: bf16[32,128], index: 4, kind: input, shape index: {}]   ;;  %s3182_s5 = inlined_call_operand.vmem [shape: bf16[128,128], index: 5, kind: input, shape index: {}]   ;;  %s3183_s6 = inlined_call_operand.vmem [shape: bf16[3,128], index: 6, kind: input, shape index: {}]   ;;  %s3184_s7 = inlined_call_operand.vmem [shape: f32[1,128], index: 7, kind: input, shape index: {}]   ;;  %s3185_s8 = inlined_call_operand.hbm [shape: f32[1000,128], index: 8, kind: output, shape index: {}]  }
   0x1   :  { %15 = vsyncpa [#allocation3 + $0x1], 0  ;;  %s2513_s27 = smov 0   ;;  %s2515_s28 = smov 0  }
   0x2   :  { %s2517_s29 = smov 0   ;;  %s2519_s30 = smov 0  }
   0x3 LB: > { %s2534_s9 = sadd.s32 4294967295, %s2459_s30   ;;  %s2001_s10 = sadd.s32 4294967294, %s2459_s30   ;;  %s2459_s30 = sphi %s2519_s30, %s3197_s30   ;;  %s2455_s29 = sphi %s2517_s29, %s3196_s29   ;;  %s2451_s28 = sphi %s2515_s28, %s3195_s28   ;;  %s2447_s27 = sphi %s2513_s27, %s3194_s27  }
   0x4   : > { %s2538_s11 = sadd.s32 1, %s2459_s30   ;;  %s211_s12 = sadd.s32 1, %s2455_s29 }
   0x5   : > { %s208_s13 = ssub.s32 %s2459_s30, %s2538_s11  ;;  %p221_p0 = scmp.ne.s32.totalorder %s2455_s29, %s2451_s28 }
   0x6   : > { %p209_p1 = scmp.eq.s32.totalorder %s208_s13, 0  ;;  %p222_p2 = scmp.eq.s32.totalorder %s2534_s9, 3 }
   0x7   : > { %p227_p3 = scmp.ne.s32.totalorder %s2451_s28, %s2447_s27  ;;  %p228_p4 = scmp.eq.s32.totalorder %s2001_s10, 3 }
   0x8   : > { %s2549_s14 = scalar_select %p209_p1, %s2455_s29, %s211_s12  }
   0x9   : > { %p2551_p5 = por %p222_p2, %p221_p0  ;;  %p2555_p6 = por %p228_p4, %p227_p3 }
   0xa   : > { %p2004_p7 = scmp.ge.s32.totalorder %s2459_s30, 1  ;;  %p312_p8 = scmp.lt.s32.totalorder %s2459_s30, 5 }
   0xc   : > { %p313_p9 = pnand %p2004_p7, %p312_p8 }
   0xd   : > { %s2562_s17 = sshll.u32 (!%p313_p9), %s2534_s9, 5 }
   0xe   : > { %316 = sbr.rel (%p313_p9) target bundleno = 771 (0x303), region = 52  ;;  %p373_p10 = scmp.lt.s32.totalorder (!%p313_p9), %s2562_s17, 124 }
  0x13   : > { %v2461_v0 = vmov 1   ;;  %s374_s18 = scalar_select %p373_p10, %s2562_s17, 124  ;;  %v2462_v7 = vmov 0   ;;  %v2388_v14 = vld [vmem:[%s3181_s4 + $0x8] sm:$0xff]   ;;  %vm1149_vm0 = vcmask 1045504   ;;  %vm1150_vm1 = vcmask 1046528  }
  0x14   : > { %2356 = vset.pattern.permute.xlu0 %v2461_v0  ;;  %2354 = vset.pattern.permute.xlu1 %v2461_v0  ;;  %v2390_v16 = vld [vmem:[%s3180_s3] sm:$0x7f]   ;;  %v2463_v17 = vmov 65535   ;;  %vm885_vm2 = vcmask 261120   ;;  %s1904_s25 = ssub.s32 (%p2551_p5), 125, %s2562_s17 }
  0x15   : > { %s2568_s19 = sshll.u32 %s374_s18, 3  ;;  %2158 = vmatprep.subr.bf16.mxu0 %v2388_v14  ;;  %v1151_v18 = vsel %vm1149_vm0, 4294967295, %v2463_v17  ;;  %v2389_v20 = vld [vmem:[%s3181_s4] sm:$0xff]   ;;  %p1905_p11 = scmp.lt.s32.totalorder (%p2551_p5), %s1904_s25, 32 }
  0x16   : > { %s2574_s22 = scalar_lea.vmem %s3177_s0, %s2568_s19  ;;  %2159 = vmatpush3.bf16.msra.mxu0 %v2388_v14  ;;  %v1152_v19 = vsel %vm1150_vm1, %v1151_v18, 0  ;;  %s2627_s20 = scalar_lea.vmem %s3178_s1, %s2568_s19 }
  0x17   : > { %v418_v1 = vld [vmem:[%s2574_s22 + $0x10] sm:$0xff]  ;;  %v416_v2 = vld [vmem:[%s2574_s22] sm:$0xff]  ;;  %v417_v4 = vld [vmem:[%s2574_s22 + $0x8] sm:$0xff]  ;;  %v1154_v21 = vand.u32 %v2390_v16, %v1152_v19  ;;  %2160 = vmatprep.subr.bf16.mxu0 %v2389_v20  ;;  %s2982_s18 = scalar_lea.vmem %s3179_s2, %s2568_s19  ;;  %s365_s19 = sand.u32 1, %s2451_s28  }
  0x18   : > { %585 = vperm.xlu0 %2356, %v418_v1   ;;  %579 = vperm.xlu1 %2354, %v416_v2   ;;  %v2579_v3 = vld [vmem:[%s2574_s22 + $0x30] sm:$0xff]  ;;  %v419_v6 = vld [vmem:[%s2574_s22 + $0x18] sm:$0xff]  ;;  %v420_v10 = vld [vmem:[%s2574_s22 + $0x20] sm:$0xff]  ;;  %s3117_s24 = scalar_lea.sflag [#allocation3], %s365_s19 }
  0x19   : > { %v2584_v5 = vld [vmem:[%s2574_s22 + $0x50] sm:$0xff]  ;;  %v421_v13 = vld [vmem:[%s2574_s22 + $0x28] sm:$0xff]  ;;  %v423_v15 = vld [vmem:[%s2574_s22 + $0x38] sm:$0xff]  ;;  %2194 = vmatprep.subr.bf16.mxu1 %v1154_v21 }
  0x1a   : > { %v2590_v8 = vld [vmem:[%s2574_s22 + $0x70] sm:$0xff]  ;;  %v821_v22 = vld [vmem:[%s2627_s20] sm:$0xff]  ;;  %v822_v23 = vld [vmem:[%s2627_s20 + $0x8] sm:$0xff]  ;;  %2161 = vmatpush3.bf16.msra.mxu0 %v2389_v20  ;;  %2195 = vmatpush3.bf16.msra.mxu1 %v1154_v21 }
  0x1b   : > { %v2595_v9 = vld [vmem:[%s2574_s22 + $0x90] sm:$0xff]  ;;  %v853_v24 = vpack.c.bf16 %v822_v23, %v821_v22  ;;  %v824_v26 = vld [vmem:[%s2627_s20 + $0x18] sm:$0xff]  ;;  %v424_v28 = vld [vmem:[%s2574_s22 + $0x40] sm:$0xff] }
  0x1c   : > { %597 = vperm.xlu0 %2356, %v2579_v3   ;;  %582 = vperm.xlu1 %2354, %v417_v4   ;;  %v2600_v11 = vld [vmem:[%s2574_s22 + $0xb0] sm:$0xff]  ;;  %v825_v29 = vld [vmem:[%s2627_s20 + $0x20] sm:$0xff]  ;;  %v826_v30 = vld [vmem:[%s2627_s20 + $0x28] sm:$0xff] }
  0x1d   : > { %v2605_v12 = vld [vmem:[%s2574_s22 + $0xd0] sm:$0xff]  ;;  %2162 = vmatprep.mubr.msk.bf16.mxu0 %vm885_vm2, %v853_v24  ;;  %v855_v31 = vpack.c.bf16 %v826_v30, %v825_v29  ;;  %v828_v33 = vld [vmem:[%s2627_s20 + $0x38] sm:$0xff]  ;;  %v425_v34 = vld [vmem:[%s2574_s22 + $0x48] sm:$0xff]  ;;  %v448_v24 = vlaneseq }
  0x1e   : > { %v823_v25 = vld [vmem:[%s2627_s20 + $0x10] sm:$0xff]  ;;  %v429_v36 = vld [vmem:[%s2574_s22 + $0x68] sm:$0xff]  ;;  %v427_v37 = vld [vmem:[%s2574_s22 + $0x58] sm:$0xff] }
  0x1f   : > { %v854_v27 = vpack.c.bf16 %v824_v26, %v823_v25  ;;  %v827_v32 = vld [vmem:[%s2627_s20 + $0x30] sm:$0xff]  ;;  %v829_v38 = vld [vmem:[%s2627_s20 + $0x40] sm:$0xff]  ;;  %v830_v39 = vld [vmem:[%s2627_s20 + $0x48] sm:$0xff] }
  0x20   : > { %609 = vperm.xlu0 %2356, %v2584_v5   ;;  %2355 = vset.pattern.permute.xlu1 %v2462_v7  ;;  %v856_v35 = vpack.c.bf16 %v828_v33, %v827_v32  ;;  %v433_v40 = vld [vmem:[%s2574_s22 + $0x88] sm:$0xff]  ;;  %v857_v41 = vpack.c.bf16 %v830_v39, %v829_v38  ;;  %v831_v42 = vld [vmem:[%s2627_s20 + $0x50] sm:$0xff]  ;;  %v832_v43 = vld [vmem:[%s2627_s20 + $0x58] sm:$0xff] }
  0x21   : > { %460 = vperm.xlu1 %2355, %v419_v6   ;;  %2163 = vmatmul.mubr.msk.bf16.vlgmr.msra.gmra.mxu0 %vm885_vm2, %v854_v27  ;;  %v858_v44 = vpack.c.bf16 %v832_v43, %v831_v42  ;;  %v428_v45 = vld [vmem:[%s2574_s22 + $0x60] sm:$0xff]  ;;  %v437_v46 = vld [vmem:[%s2574_s22 + $0xa8] sm:$0xff]  ;;  %v431_v48 = vld [vmem:[%s2574_s22 + $0x78] sm:$0xff]  ;;  %v2728_v27 = vand.u32 127, %v448_v24 }
  0x22   : > { %2166 = vmatprep.mubr.msk.bf16.mxu0 %vm885_vm2, %v855_v31  ;;  %v2667_v47 = vld [vmem:[%s2574_s22 + $0xc8] sm:$0xff]  ;;  %v833_v49 = vld [vmem:[%s2627_s20 + $0x60] sm:$0xff]  ;;  %v835_v53 = vld [vmem:[%s2627_s20 + $0x70] sm:$0xff] }
  0x23   : > { %v834_v50 = vld [vmem:[%s2627_s20 + $0x68] sm:$0xff]  ;;  %v836_v54 = vld [vmem:[%s2627_s20 + $0x78] sm:$0xff]  ;;  %v432_v56 = vld [vmem:[%s2574_s22 + $0x80] sm:$0xff]  ;;  %vm738_vm8 = vcmp.eq.s32.totalorder %v2728_v27, 12 }
  0x24   : > { %621 = vperm.xlu0 %2356, %v2590_v8   ;;  %v2677_v51 = vld [vmem:[%s2574_s22 + $0xe8] sm:$0xff]  ;;  %v859_v52 = vpack.c.bf16 %v834_v50, %v833_v49  ;;  %v860_v55 = vpack.c.bf16 %v836_v54, %v835_v53  ;;  %v446_v57 = vld [vmem:[%s2574_s22 + $0xf0] sm:$0xff]  ;;  %v435_v58 = vld [vmem:[%s2574_s22 + $0x98] sm:$0xff] }
  0x25   : > { %2357 = vset.pattern.permute.xlu1 %v2461_v0  ;;  %v837_v59 = vld [vmem:[%s2627_s20 + $0x80] sm:$0xff]  ;;  %v838_v60 = vld [vmem:[%s2627_s20 + $0x88] sm:$0xff]  ;;  %v839_v62 = vld [vmem:[%s2627_s20 + $0x90] sm:$0xff] }
  0x26   : > { %588 = vperm.xlu1 %2357, %v419_v6   ;;  %v861_v61 = vpack.c.bf16 %v838_v60, %v837_v59  ;;  %v840_v63 = vld [vmem:[%s2627_s20 + $0x98] sm:$0xff]  ;;  %v843_v14 = vld [vmem:[%s2627_s20 + $0xb0] sm:$0xff]  ;;  %v440_v19 = vld [vmem:[%s2574_s22 + $0xc0] sm:$0xff] }
  0x27   : > { %v847_v38 = vld [vmem:[%s2627_s20 + $0xd0] sm:$0xff]  ;;  %v848_v39 = vld [vmem:[%s2627_s20 + $0xd8] sm:$0xff]  ;;  %v444_v43 = vld [vmem:[%s2574_s22 + $0xe0] sm:$0xff] }
  0x28   : > { %633 = vperm.xlu0 %2356, %v2595_v9   ;;  %v2394_v24 = vld [vmem:[%s3182_s5 + $0x20] sm:$0xff]  }
  0x29   : > { %2167 = vmatmul.mubr.msk.bf16.gmra.mxu0 %vm885_vm2, %v856_v35  ;;  %v845_v35 = vld [vmem:[%s2627_s20 + $0xc0] sm:$0xff] }
  0x2a   : > { %2358 = vset.pattern.permute.xlu1 %v2462_v7  ;;  %2170 = vmatprep.mubr.msk.bf16.mxu0 %vm885_vm2, %v857_v41 }
  0x2b   : > { %463 = vperm.xlu1 %2358, %v420_v10  }
  0x2c   : > { %645 = vperm.xlu0 %2356, %v2600_v11  }
  0x2f   : > { %2359 = vset.pattern.permute.xlu1 %v2461_v0 }
  0x30   : > { %657 = vperm.xlu0 %2356, %v2605_v12   ;;  %591 = vperm.xlu1 %2359, %v420_v10  }
  0x31   : > { %2171 = vmatmul.mubr.msk.bf16.gmra.mxu0 %vm885_vm2, %v858_v44  ;;  %v2464_v44 = vmov 0.0  }
  0x32   : > { %2174 = vmatprep.mubr.msk.bf16.mxu0 %vm885_vm2, %v859_v52 }
  0x34   : > { %2381 = vset.pattern.permute.xlu0 %v2462_v7  ;;  %594 = vperm.xlu1 %2359, %v421_v13  }
  0x35   : > { %451 = vperm.xlu0 %2381, %v416_v2   ;;  %v436_v2 = vld [vmem:[%s2574_s22 + $0xa0] sm:$0xff] }
  0x38   : > { %2360 = vset.pattern.permute.xlu1 %v2462_v7 }
  0x39   : > { %454 = vperm.xlu0 %2381, %v417_v4   ;;  %472 = vperm.xlu1 %2360, %v423_v15  }
  0x3a   : > { %2175 = vmatmul.mubr.msk.bf16.gmra.mxu0 %vm885_vm2, %v860_v55 }
  0x3b   : > { %2178 = vmatprep.mubr.msk.bf16.mxu0 %vm885_vm2, %v861_v61 }
  0x3d   : > { %457 = vperm.xlu0 %2381, %v418_v1   ;;  %2361 = vset.pattern.permute.xlu1 %v2461_v0  ;;  %v862_v1 = vpack.c.bf16 %v840_v63, %v839_v62 }
  0x3e   : > { %600 = vperm.xlu1 %2361, %v423_v15   ;;  %v844_v15 = vld [vmem:[%s2627_s20 + $0xb8] sm:$0xff] }
  0x3f   : > { %v864_v18 = vpack.c.bf16 %v844_v15, %v843_v14  ;;  %v2392_v14 = vld [vmem:[%s3182_s5 + $0x30] sm:$0xff]  }
  0x41   : > { %466 = vperm.xlu0 %2381, %v421_v13  }
  0x42   : > { %2362 = vset.pattern.permute.xlu1 %v2462_v7  ;;  %2179 = vmatmul.mubr.msk.bf16.gmra.mxu0 %vm885_vm2, %v862_v1  ;;  %v447_v1 = vld [vmem:[%s2574_s22 + $0xf8] sm:$0xff] }
  0x43   : > { %475 = vperm.xlu1 %2362, %v424_v28  }
  0x45   : > { %469 = vperm.xlu0 %2381, %v2579_v3  }
  0x47   : > { %2363 = vset.pattern.permute.xlu1 %v2461_v0 }
  0x48   : > { %603 = vperm.xlu1 %2363, %v424_v28   ;;  %v443_v28 = vld [vmem:[%s2574_s22 + $0xd8] sm:$0xff] }
  0x49   : > { %478 = vperm.xlu0 %2381, %v425_v34  }
  0x4c   : > { %606 = vperm.xlu1 %2363, %v425_v34  }
  0x4d   : > { %481 = vperm.xlu0 %2381, %v2584_v5   ;;  %v439_v5 = vld [vmem:[%s2574_s22 + $0xb8] sm:$0xff] }
  0x50   : > { %2364 = vset.pattern.permute.xlu1 %v2462_v7 }
  0x51   : > { %490 = vperm.xlu0 %2381, %v429_v36   ;;  %484 = vperm.xlu1 %2364, %v427_v37  }
  0x55   : > { %493 = vperm.xlu0 %2381, %v2590_v8   ;;  %2365 = vset.pattern.permute.xlu1 %v2461_v0 }
  0x56   : > { %612 = vperm.xlu1 %2365, %v427_v37  }
  0x59   : > { %502 = vperm.xlu0 %2381, %v433_v40  }
  0x5a   : > { %2366 = vset.pattern.permute.xlu1 %v2462_v7 }
  0x5b   : > { %487 = vperm.xlu1 %2366, %v428_v45  }
  0x5d   : > { %505 = vperm.xlu0 %2381, %v2595_v9  }
  0x5f   : > { %2367 = vset.pattern.permute.xlu1 %v2461_v0 }
  0x60   : > { %615 = vperm.xlu1 %2367, %v428_v45  }
  0x61   : > { %514 = vperm.xlu0 %2381, %v437_v46  }
  0x64   : > { %618 = vperm.xlu1 %2367, %v429_v36   ;;  %v846_v36 = vld [vmem:[%s2627_s20 + $0xc8] sm:$0xff] }
  0x65   : > { %517 = vperm.xlu0 %2381, %v2600_v11   ;;  %v841_v11 = vld [vmem:[%s2627_s20 + $0xa0] sm:$0xff]  ;;  %v865_v37 = vpack.c.bf16 %v846_v36, %v845_v35 }
  0x68   : > { %2368 = vset.pattern.permute.xlu1 %v2462_v7 }
  0x69   : > { %526 = vperm.xlu0 %2381, %v2667_v47   ;;  %496 = vperm.xlu1 %2368, %v431_v48  }
  0x6d   : > { %529 = vperm.xlu0 %2381, %v2605_v12   ;;  %2369 = vset.pattern.permute.xlu1 %v2461_v0  ;;  %v842_v12 = vld [vmem:[%s2627_s20 + $0xa8] sm:$0xff] }
  0x6e   : > { %624 = vperm.xlu1 %2369, %v431_v48   ;;  %v863_v13 = vpack.c.bf16 %v842_v12, %v841_v11 }
  0x70   : > { %2182 = vmatprep.mubr.msk.bf16.mxu0 %vm885_vm2, %v863_v13 }
  0x71   : > { %538 = vperm.xlu0 %2381, %v2677_v51   ;;  %2183 = vmatmul.mubr.msk.bf16.gmra.mxu0 %vm885_vm2, %v864_v18  ;;  %v2393_v18 = vld [vmem:[%s3182_s5 + $0x28] sm:$0xff]  }
  0x72   : > { %2370 = vset.pattern.permute.xlu1 %v2462_v7  ;;  %2186 = vmatprep.mubr.msk.bf16.mxu0 %vm885_vm2, %v865_v37 }
  0x73   : > { %499 = vperm.xlu1 %2370, %v432_v56  }
  0x75   : > { %541 = vperm.xlu0 %2381, %v446_v57  }
  0x77   : > { %2371 = vset.pattern.permute.xlu1 %v2461_v0 }
  0x78   : > { %627 = vperm.xlu1 %2371, %v432_v56  }
  0x79   : > { %2386 = vset.pattern.permute.xlu0 %v2461_v0 }
  0x7a   : > { %669 = vperm.xlu0 %2386, %v446_v57  }
  0x7c   : > { %630 = vperm.xlu1 %2371, %v433_v40   ;;  %v866_v40 = vpack.c.bf16 %v848_v39, %v847_v38 }
  0x7e   : > { %2187 = vmatmul.mubr.msk.bf16.gmra.mxu0 %vm885_vm2, %v866_v40 }
  0x80   : > { %2372 = vset.pattern.permute.xlu1 %v2462_v7 }
  0x81   : > { %508 = vperm.xlu1 %2372, %v435_v58  }
  0x85   : > { %2373 = vset.pattern.permute.xlu1 %v2461_v0 }
  0x86   : > { %636 = vperm.xlu1 %2373, %v435_v58  }
  0x8a   : > { %2374 = vset.pattern.permute.xlu1 %v2462_v7 }
  0x8b   : > { %511 = vperm.xlu1 %2374, %v436_v2  }
  0x8f   : > { %2375 = vset.pattern.permute.xlu1 %v2461_v0 }
  0x90   : > { %639 = vperm.xlu1 %2375, %v436_v2   ;;  %v849_v2 = vld [vmem:[%s2627_s20 + $0xe0] sm:$0xff] }
  0x93   : > { %v580_v3 = vpop.permute.xlu1 %579  ;;  %v2701_v4 = vpop.permute.xlu0 %585 }
  0x94   : > { %642 = vperm.xlu1 %2375, %v437_v46   ;;  %vm674_vm3 = vcmp.eq.s32.totalorder %v2728_v27, %v580_v3  ;;  %vm676_vm15 = vcmp.eq.s32.totalorder %v2728_v27, %v2701_v4  ;;  %v850_v3 = vld [vmem:[%s2627_s20 + $0xe8] sm:$0xff] }
  0x97   : > { %v583_v6 = vpop.permute.xlu1 %582  ;;  %v2704_v8 = vpop.permute.xlu0 %597 }
  0x98   : > { %2376 = vset.pattern.permute.xlu1 %v2462_v7  ;;  %vm675_vm10 = vcmp.eq.s32.totalorder %v2728_v27, %v583_v6  ;;  %v851_v6 = vld [vmem:[%s2627_s20 + $0xf0] sm:$0xff] }
  0x99   : > { %520 = vperm.xlu1 %2376, %v439_v5  }
  0x9b   : > { %v2707_v9 = vpop.permute.xlu0 %609 }
  0x9c   : > { %v461_v10 = vpop.permute.xlu1 %460 }
  0x9d   : > { %2377 = vset.pattern.permute.xlu1 %v2461_v0  ;;  %vm549_vm7 = vcmp.eq.s32.totalorder %v2728_v27, %v461_v10 }
  0x9e   : > { %648 = vperm.xlu1 %2377, %v439_v5   ;;  %v867_v5 = vpack.c.bf16 %v850_v3, %v849_v2 }
  0x9f   : > { %v2714_v16 = vpop.permute.xlu0 %621 }
  0xa0   : > { %2190 = vmatprep.mubr.msk.bf16.mxu0 %vm885_vm2, %v867_v5 }
  0xa1   : > { %v589_v20 = vpop.permute.xlu1 %588 }
  0xa2   : > { %2378 = vset.pattern.permute.xlu1 %v2462_v7  ;;  %vm677_vm4 = vcmp.eq.s32.totalorder %v2728_v27, %v589_v20 }
  0xa3   : > { %523 = vperm.xlu1 %2378, %v440_v19   ;;  %v2720_v21 = vpop.permute.xlu0 %633  ;;  %vm2737_vm9 = vmor %vm549_vm7, %vm677_vm4  ;;  %vm1100_vm4 = vcmask 105472  }
  0xa4   : > { %vm2763_vm1 = vmor %vm2737_vm9, %vm738_vm8 }
  0xa5   : > { %v774_v49 = vsel %vm2763_vm1, 1.0, %v2464_v44 }
  0xa6   : > { %v464_v22 = vpop.permute.xlu1 %463 }
  0xa7   : > { %2379 = vset.pattern.permute.xlu1 %v2461_v0  ;;  %v2723_v23 = vpop.permute.xlu0 %645 }
  0xa8   : > { %651 = vperm.xlu1 %2379, %v440_v19  }
  0xab   : > { %v592_v25 = vpop.permute.xlu1 %591  ;;  %v2725_v26 = vpop.permute.xlu0 %657 }
  0xac   : > { %654 = vperm.xlu1 %2379, %v2667_v47   ;;  %vm678_vm13 = vcmp.eq.s32.totalorder %v2728_v27, %v592_v25 }
  0xaf   : > { %v595_v29 = vpop.permute.xlu1 %594 }
  0xb0   : > { %v452_v30 = vpop.permute.xlu0 %451  ;;  %2380 = vset.pattern.permute.xlu1 %v2462_v7 }
  0xb1   : > { %vm546_vm5 = vcmp.eq.s32.totalorder %v2728_v27, %v452_v30  ;;  %532 = vperm.xlu1 %2380, %v443_v28  }
  0xb2   : > { %vm706_vm6 = vmor %vm546_vm5, %vm674_vm3  ;;  %vm550_vm3 = vcmp.eq.s32.totalorder %v2728_v27, %v464_v22 }
  0xb3   : > { %vm2744_vm11 = vmor %vm706_vm6, %vm738_vm8 }
  0xb4   : > { %v455_v32 = vpop.permute.xlu0 %454  ;;  %v473_v33 = vpop.permute.xlu1 %472  ;;  %v771_v45 = vsel %vm2744_vm11, 1.0, %v2464_v44  ;;  %vm710_vm5 = vmor %vm550_vm3, %vm678_vm13  ;;  %vm679_vm13 = vcmp.eq.s32.totalorder %v2728_v27, %v595_v29  ;;  %vm680_vm3 = vcmp.eq.s32.totalorder %v2728_v27, %v2704_v8 }
  0xb5   : > { %vm547_vm12 = vcmp.eq.s32.totalorder %v2728_v27, %v455_v32  ;;  %2382 = vset.pattern.permute.xlu1 %v2461_v0  ;;  %vm743_vm11 = vmor %vm710_vm5, %vm738_vm8 }
  0xb6   : > { %vm707_vm14 = vmor %vm547_vm12, %vm675_vm10  ;;  %660 = vperm.xlu1 %2382, %v443_v28   ;;  %vm553_vm12 = vcmp.eq.s32.totalorder %v2728_v27, %v473_v33  ;;  %v775_v55 = vsel %vm743_vm11, 1.0, %v2464_v44  ;;  %v2395_v28 = vld [vmem:[%s3182_s5 + $0x18] sm:$0xff]  }
  0xb7   : > { %vm740_vm0 = vmor %vm707_vm14, %vm738_vm8 }
  0xb8   : > { %v458_v42 = vpop.permute.xlu0 %457  ;;  %v772_v46 = vsel %vm740_vm0, 1.0, %v2464_v44 }
  0xb9   : > { %vm548_vm6 = vcmp.eq.s32.totalorder %v2728_v27, %v458_v42  ;;  %v601_v47 = vpop.permute.xlu1 %600  ;;  %v803_v48 = vpack.c.bf16 %v772_v46, %v771_v45 }
  0xba   : > { %vm708_vm7 = vmor %vm548_vm6, %vm676_vm15  ;;  %vm681_vm9 = vcmp.eq.s32.totalorder %v2728_v27, %v601_v47  ;;  %2383 = vset.pattern.permute.xlu1 %v2462_v7 }
  0xbb   : > { %vm741_vm10 = vmor %vm708_vm7, %vm738_vm8  ;;  %535 = vperm.xlu1 %2383, %v444_v43   ;;  %2196 = vmatprep.mubr.msk.bf16.mxu1 %vm1100_vm4, %v803_v48 }
  0xbc   : > { %v773_v50 = vsel %vm741_vm10, 1.0, %v2464_v44  ;;  %v467_v52 = vpop.permute.xlu0 %466  ;;  %vm713_vm14 = vmor %vm553_vm12, %vm681_vm9 }
  0xbd   : > { %v804_v53 = vpack.c.bf16 %v774_v49, %v773_v50  ;;  %vm551_vm15 = vcmp.eq.s32.totalorder %v2728_v27, %v467_v52  ;;  %vm746_vm5 = vmor %vm713_vm14, %vm738_vm8  ;;  %v2396_v49 = vld [vmem:[%s3182_s5 + $0x10] sm:$0xff]  }
  0xbe   : > { %vm711_vm0 = vmor %vm551_vm15, %vm679_vm13  ;;  %v476_v54 = vpop.permute.xlu1 %475  ;;  %v778_v60 = vsel %vm746_vm5, 1.0, %v2464_v44 }
  0xbf   : > { %vm744_vm1 = vmor %vm711_vm0, %vm738_vm8  ;;  %2384 = vset.pattern.permute.xlu1 %v2461_v0  ;;  %2197 = vmatmul.mubr.msk.bf16.vlgmr.msra.gmra.mxu1 %vm1100_vm4, %v804_v53  ;;  %vm554_vm10 = vcmp.eq.s32.totalorder %v2728_v27, %v476_v54  ;;  %v1397_v54 = vld [vmem:[%s3183_s6] sm:$0x3] }
  0xc0   : > { %v776_v56 = vsel %vm744_vm1, 1.0, %v2464_v44  ;;  %v470_v57 = vpop.permute.xlu0 %469  ;;  %663 = vperm.xlu1 %2384, %v444_v43   ;;  %vm684_vm1 = vcmp.eq.s32.totalorder %v2728_v27, %v2707_v9  ;;  %v2391_v9 = vld [vmem:[%s3182_s5 + $0x38] sm:$0xff]  }
  0xc1   : > { %v805_v58 = vpack.c.bf16 %v776_v56, %v775_v55  ;;  %vm552_vm6 = vcmp.eq.s32.totalorder %v2728_v27, %v470_v57  ;;  %2262 = vmatprep.subr.bf16.mxu0 %v2391_v9 }
  0xc2   : > { %vm712_vm7 = vmor %vm552_vm6, %vm680_vm3  ;;  %2263 = vmatpush3.bf16.msra.mxu0 %v2391_v9 }
  0xc3   : > { %vm745_vm9 = vmor %vm712_vm7, %vm738_vm8  ;;  %2200 = vmatprep.mubr.msk.bf16.mxu1 %vm1100_vm4, %v805_v58  ;;  %v604_v59 = vpop.permute.xlu1 %603  ;;  %2264 = vmatprep.subr.bf16.mxu0 %v2392_v14 }
  0xc4   : > { %v777_v61 = vsel %vm745_vm9, 1.0, %v2464_v44  ;;  %vm682_vm11 = vcmp.eq.s32.totalorder %v2728_v27, %v604_v59  ;;  %v479_v62 = vpop.permute.xlu0 %478  ;;  %666 = vperm.xlu1 %2384, %v2677_v51   ;;  %v852_v51 = vld [vmem:[%s2627_s20 + $0xf8] sm:$0xff]  ;;  %v2398_v59 = vld [vmem:[%s3182_s5] sm:$0xff]   ;;  %s2005_s20 = sshll.u32 %s365_s19, 8 }
  0xc5   : > { %v806_v63 = vpack.c.bf16 %v778_v60, %v777_v61  ;;  %vm714_vm12 = vmor %vm554_vm10, %vm682_vm11  ;;  %vm555_vm13 = vcmp.eq.s32.totalorder %v2728_v27, %v479_v62  ;;  %v868_v8 = vpack.c.bf16 %v852_v51, %v851_v6  ;;  %s3050_s23 = scalar_lea.vmem [#allocation2], %s2005_s20 }
  0xc6   : > { %vm747_vm14 = vmor %vm714_vm12, %vm738_vm8  ;;  %2265 = vmatpush3.bf16.msra.mxu0 %v2392_v14 }
  0xc7   : > { %2201 = vmatmul.mubr.msk.bf16.gmra.mxu1 %vm1100_vm4, %v806_v63  ;;  %v607_v4 = vpop.permute.xlu1 %606  ;;  %v779_v11 = vsel %vm747_vm14, 1.0, %v2464_v44  ;;  %2191 = vmatmul.mubr.msk.bf16.gmra.mxu0 %vm885_vm2, %v868_v8 }
  0xc8   : > { %vm683_vm15 = vcmp.eq.s32.totalorder %v2728_v27, %v607_v4  ;;  %2385 = vset.pattern.permute.xlu1 %v2462_v7  ;;  %v482_v10 = vpop.permute.xlu0 %481  ;;  %2266 = vmatprep.subr.bf16.mxu0 %v2393_v18 }
  0xc9   : > { %vm715_vm0 = vmor %vm555_vm13, %vm683_vm15  ;;  %544 = vperm.xlu1 %2385, %v447_v1   ;;  %vm556_vm5 = vcmp.eq.s32.totalorder %v2728_v27, %v482_v10 }
  0xca   : > { %vm748_vm3 = vmor %vm715_vm0, %vm738_vm8  ;;  %2267 = vmatpush3.bf16.msra.mxu0 %v2393_v18 }
  0xcb   : > { %v780_v12 = vsel %vm748_vm3, 1.0, %v2464_v44  ;;  %vm716_vm6 = vmor %vm556_vm5, %vm684_vm1  ;;  %2268 = vmatprep.subr.bf16.mxu0 %v2394_v24 }
  0xcc   : > { %v807_v7 = vpack.c.bf16 %v780_v12, %v779_v11  ;;  %v485_v13 = vpop.permute.xlu1 %484  ;;  %vm749_vm7 = vmor %vm716_vm6, %vm738_vm8  ;;  %v491_v29 = vpop.permute.xlu0 %490  ;;  %vm688_vm6 = vcmp.eq.s32.totalorder %v2728_v27, %v2714_v16 }
  0xcd   : > { %2387 = vset.pattern.permute.xlu1 %v2461_v0  ;;  %vm557_vm9 = vcmp.eq.s32.totalorder %v2728_v27, %v485_v13  ;;  %v781_v0 = vsel %vm749_vm7, 1.0, %v2464_v44  ;;  %vm559_vm15 = vcmp.eq.s32.totalorder %v2728_v27, %v491_v29 }
  0xce   : > { %672 = vperm.xlu1 %2387, %v447_v1   ;;  %2204 = vmatprep.mubr.msk.bf16.mxu1 %vm1100_vm4, %v807_v7 }
  0xcf   : > { %2269 = vmatpush3.bf16.msra.mxu0 %v2394_v24 }
  0xd0   : > { %2270 = vmatprep.subr.bf16.mxu0 %v2395_v28  ;;  %v494_v33 = vpop.permute.xlu0 %493 }
  0xd1   : > { %v613_v15 = vpop.permute.xlu1 %612  ;;  %vm560_vm7 = vcmp.eq.s32.totalorder %v2728_v27, %v494_v33 }
  0xd2   : > { %vm685_vm2 = vcmp.eq.s32.totalorder %v2728_v27, %v613_v15 }
  0xd3   : > { %vm717_vm10 = vmor %vm557_vm9, %vm685_vm2  ;;  %2271 = vmatpush3.bf16.msra.mxu0 %v2395_v28 }
  0xd4   : > { %vm750_vm11 = vmor %vm717_vm10, %vm738_vm8  ;;  %v503_v41 = vpop.permute.xlu0 %502  ;;  %2272 = vmatprep.subr.bf16.mxu0 %v2396_v49 }
  0xd5   : > { %v782_v19 = vsel %vm750_vm11, 1.0, %v2464_v44  ;;  %vm720_vm2 = vmor %vm560_vm7, %vm688_vm6 }
  0xd6   : > { %v488_v20 = vpop.permute.xlu1 %487  ;;  %v808_v22 = vpack.c.bf16 %v782_v19, %v781_v0  ;;  %vm753_vm10 = vmor %vm720_vm2, %vm738_vm8  ;;  %vm692_vm2 = vcmp.eq.s32.totalorder %v2728_v27, %v2720_v21  ;;  %v2397_v21 = vld [vmem:[%s3182_s5 + $0x8] sm:$0xff]  }
  0xd7   : > { %vm558_vm12 = vcmp.eq.s32.totalorder %v2728_v27, %v488_v20  ;;  %v785_v37 = vsel %vm753_vm10, 1.0, %v2464_v44  ;;  %vm1447_vm10 = vcmask 1040384   ;;  %2273 = vmatpush3.bf16.msra.mxu0 %v2396_v49 }
  0xd8   : > { %2205 = vmatmul.mubr.msk.bf16.gmra.mxu1 %vm1100_vm4, %v808_v22  ;;  %v506_v43 = vpop.permute.xlu0 %505  ;;  %v1449_v52 = vsel %vm1447_vm10, 4294967295, %v2463_v17  ;;  %2274 = vmatprep.subr.bf16.mxu0 %v2397_v21 }
  0xdb   : > { %v616_v25 = vpop.permute.xlu1 %615  ;;  %2275 = vmatpush3.bf16.msra.mxu0 %v2397_v21  ;;  %v1360_v21 = vld [vmem:[%s2982_s18 + $0x58] sm:$0xff] }
  0xdc   : > { %vm686_vm13 = vcmp.eq.s32.totalorder %v2728_v27, %v616_v25  ;;  %2276 = vmatprep.subr.bf16.mxu0 %v2398_v59  ;;  %v515_v61 = vpop.permute.xlu0 %514 }
  0xdd   : > { %vm718_vm14 = vmor %vm558_vm12, %vm686_vm13 }
  0xde   : > { %vm751_vm0 = vmor %vm718_vm14, %vm738_vm8 }
  0xdf   : > { %v619_v30 = vpop.permute.xlu1 %618  ;;  %v783_v31 = vsel %vm751_vm0, 1.0, %v2464_v44  ;;  %2277 = vmatpush3.bf16.msra.mxu0 %v2398_v59  ;;  %v1366_v59 = vld [vmem:[%s2982_s18 + $0x88] sm:$0xff] }
  0xe0   : > { %vm687_vm3 = vcmp.eq.s32.totalorder %v2728_v27, %v619_v30  ;;  %v518_v63 = vpop.permute.xlu0 %517 }
  0xe1   : > { %vm719_vm1 = vmor %vm559_vm15, %vm687_vm3  ;;  %vm563_vm3 = vcmp.eq.s32.totalorder %v2728_v27, %v503_v41  ;;  %v1352_v41 = vld [vmem:[%s2982_s18 + $0x18] sm:$0xff] }
  0xe2   : > { %vm752_vm5 = vmor %vm719_vm1, %vm738_vm8 }
  0xe3   : > { %v784_v32 = vsel %vm752_vm5, 1.0, %v2464_v44 }
  0xe4   : > { %v809_v34 = vpack.c.bf16 %v784_v32, %v783_v31  ;;  %v497_v35 = vpop.permute.xlu1 %496  ;;  %v527_v10 = vpop.permute.xlu0 %526 }
  0xe5   : > { %vm561_vm11 = vcmp.eq.s32.totalorder %v2728_v27, %v497_v35  ;;  %v1349_v35 = vld [vmem:[%s2982_s18] sm:$0xff] }
  0xe6   : > { %2208 = vmatprep.mubr.msk.bf16.mxu1 %vm1100_vm4, %v809_v34 }
  0xe8   : > { %v530_v7 = vpop.permute.xlu0 %529 }
  0xe9   : > { %v625_v36 = vpop.permute.xlu1 %624 }
  0xea   : > { %vm689_vm9 = vcmp.eq.s32.totalorder %v2728_v27, %v625_v36  ;;  %v1350_v36 = vld [vmem:[%s2982_s18 + $0x8] sm:$0xff] }
  0xeb   : > { %vm721_vm12 = vmor %vm561_vm11, %vm689_vm9  ;;  %vm564_vm9 = vcmp.eq.s32.totalorder %v2728_v27, %v506_v43 }
  0xec   : > { %vm754_vm13 = vmor %vm721_vm12, %vm738_vm8  ;;  %v539_v18 = vpop.permute.xlu0 %538 }
  0xed   : > { %v786_v16 = vsel %vm754_vm13, 1.0, %v2464_v44  ;;  %vm724_vm11 = vmor %vm564_vm9, %vm692_vm2 }
  0xee   : > { %v500_v38 = vpop.permute.xlu1 %499  ;;  %v810_v39 = vpack.c.bf16 %v786_v16, %v785_v37  ;;  %vm757_vm12 = vmor %vm724_vm11, %vm738_vm8 }
  0xef   : > { %vm562_vm14 = vcmp.eq.s32.totalorder %v2728_v27, %v500_v38  ;;  %v789_v53 = vsel %vm757_vm12, 1.0, %v2464_v44  ;;  %vm696_vm12 = vcmp.eq.s32.totalorder %v2728_v27, %v2723_v23  ;;  %v1381_v38 = vpack.c.bf16 %v1350_v36, %v1349_v35 }
  0xf0   : > { %2209 = vmatmul.mubr.msk.bf16.gmra.mxu1 %vm1100_vm4, %v810_v39  ;;  %v542_v24 = vpop.permute.xlu0 %541 }
  0xf3   : > { %v628_v40 = vpop.permute.xlu1 %627 }
  0xf4   : > { %vm690_vm15 = vcmp.eq.s32.totalorder %v2728_v27, %v628_v40  ;;  %v1351_v40 = vld [vmem:[%s2982_s18 + $0x10] sm:$0xff] }
  0xf5   : > { %vm722_vm0 = vmor %vm562_vm14, %vm690_vm15  ;;  %v670_v29 = vpop.permute.xlu0 %669  ;;  %v1382_v43 = vpack.c.bf16 %v1352_v41, %v1351_v40 }
  0xf6   : > { %vm755_vm1 = vmor %vm722_vm0, %vm738_vm8 }
  0xf7   : > { %v631_v42 = vpop.permute.xlu1 %630  ;;  %v787_v45 = vsel %vm755_vm1, 1.0, %v2464_v44 }
  0xf8   : > { %vm691_vm5 = vcmp.eq.s32.totalorder %v2728_v27, %v631_v42  ;;  %v1354_v42 = vld [vmem:[%s2982_s18 + $0x28] sm:$0xff] }
  0xf9   : > { %vm723_vm6 = vmor %vm563_vm3, %vm691_vm5  ;;  %vm1448_vm3 = vcmask 1041408  }
  0xfa   : > { %vm756_vm7 = vmor %vm723_vm6, %vm738_vm8  ;;  %v1450_v55 = vsel %vm1448_vm3, %v1449_v52, 0  ;;  %v1359_v52 = vld [vmem:[%s2982_s18 + $0x50] sm:$0xff] }
  0xfb   : > { %v788_v46 = vsel %vm756_vm7, 1.0, %v2464_v44  ;;  %v1452_v58 = vand.u32 %v1450_v55, %v1397_v54  ;;  %vm567_vm7 = vcmp.eq.s32.totalorder %v2728_v27, %v515_v61  ;;  %v1386_v54 = vpack.c.bf16 %v1360_v21, %v1359_v52 }
  0xfc   : > { %v811_v47 = vpack.c.bf16 %v788_v46, %v787_v45  ;;  %v509_v48 = vpop.permute.xlu1 %508  ;;  %v1356_v46 = vld [vmem:[%s2982_s18 + $0x38] sm:$0xff] }
  0xfd   : > { %vm565_vm13 = vcmp.eq.s32.totalorder %v2728_v27, %v509_v48  ;;  %2228 = vmatprep.subr.bf16.mxu1 %v1452_v58  ;;  %v1358_v48 = vld [vmem:[%s2982_s18 + $0x48] sm:$0xff] }
  0xfe   : > { %2212 = vmatprep.mubr.msk.bf16.mxu1 %vm1100_vm4, %v811_v47  ;;  %2229 = vmatpush3.bf16.msra.mxu1 %v1452_v58  ;;  %v1357_v47 = vld [vmem:[%s2982_s18 + $0x40] sm:$0xff] }
  0xff   : > { %v1365_v58 = vld [vmem:[%s2982_s18 + $0x80] sm:$0xff] }
 0x100   : > { %v1389_v61 = vpack.c.bf16 %v1366_v59, %v1365_v58 }
 0x101   : > { %v637_v50 = vpop.permute.xlu1 %636 }
 0x102   : > { %vm693_vm14 = vcmp.eq.s32.totalorder %v2728_v27, %v637_v50  ;;  %v1385_v50 = vpack.c.bf16 %v1358_v48, %v1357_v47  ;;  %v1380_v47 = vld [vmem:[%s2982_s18 + $0xf8] sm:$0xff] }
 0x103   : > { %vm725_vm15 = vmor %vm565_vm13, %vm693_vm14  ;;  %vm568_vm13 = vcmp.eq.s32.totalorder %v2728_v27, %v518_v63  ;;  %v1367_v63 = vld [vmem:[%s2982_s18 + $0x90] sm:$0xff] }
 0x104   : > { %vm758_vm0 = vmor %vm725_vm15, %vm738_vm8 }
 0x105   : > { %v790_v17 = vsel %vm758_vm0, 1.0, %v2464_v44  ;;  %vm728_vm14 = vmor %vm568_vm13, %vm696_vm12 }
 0x106   : > { %v812_v56 = vpack.c.bf16 %v790_v17, %v789_v53  ;;  %v512_v57 = vpop.permute.xlu1 %511  ;;  %vm761_vm15 = vmor %vm728_vm14, %vm738_vm8  ;;  %vm700_vm14 = vcmp.eq.s32.totalorder %v2728_v27, %v2725_v26  ;;  %v1361_v53 = vld [vmem:[%s2982_s18 + $0x60] sm:$0xff]  ;;  %v1362_v17 = vld [vmem:[%s2982_s18 + $0x68] sm:$0xff] }
 0x107   : > { %vm566_vm1 = vcmp.eq.s32.totalorder %v2728_v27, %v512_v57  ;;  %v793_v23 = vsel %vm761_vm15, 1.0, %v2464_v44  ;;  %vm572_vm15 = vcmp.eq.s32.totalorder %v2728_v27, %v530_v7  ;;  %v1387_v55 = vpack.c.bf16 %v1362_v17, %v1361_v53  ;;  %v1364_v57 = vld [vmem:[%s2982_s18 + $0x78] sm:$0xff] }
 0x108   : > { %2213 = vmatmul.mubr.msk.bf16.gmra.mxu1 %vm1100_vm4, %v812_v56  ;;  %v1363_v56 = vld [vmem:[%s2982_s18 + $0x70] sm:$0xff] }
 0x10b   : > { %v640_v60 = vpop.permute.xlu1 %639 }
 0x10c   : > { %vm694_vm5 = vcmp.eq.s32.totalorder %v2728_v27, %v640_v60  ;;  %v1388_v60 = vpack.c.bf16 %v1364_v57, %v1363_v56 }
 0x10d   : > { %vm726_vm6 = vmor %vm566_vm1, %vm694_vm5 }
 0x10e   : > { %vm759_vm2 = vmor %vm726_vm6, %vm738_vm8 }
 0x10f   : > { %v643_v62 = vpop.permute.xlu1 %642  ;;  %v791_v1 = vsel %vm759_vm2, 1.0, %v2464_v44 }
 0x110   : > { %vm695_vm9 = vcmp.eq.s32.totalorder %v2728_v27, %v643_v62  ;;  %v2164_v62 = vpop.f32.mrf.mxu0 }
 0x111   : > { %vm727_vm10 = vmor %vm567_vm7, %vm695_vm9  ;;  %vm571_vm9 = vcmp.eq.s32.totalorder %v2728_v27, %v527_v10 }
 0x112   : > { %vm760_vm11 = vmor %vm727_vm10, %vm738_vm8 }
 0x113   : > { %v792_v2 = vsel %vm760_vm11, 1.0, %v2464_v44 }
 0x114   : > { %v813_v3 = vpack.c.bf16 %v792_v2, %v791_v1  ;;  %v521_v4 = vpop.permute.xlu1 %520  ;;  %v1368_v1 = vld [vmem:[%s2982_s18 + $0x98] sm:$0xff]  ;;  %v1369_v2 = vld [vmem:[%s2982_s18 + $0xa0] sm:$0xff] }
 0x115   : > { %vm569_vm0 = vcmp.eq.s32.totalorder %v2728_v27, %v521_v4  ;;  %v968_v4 = vpop.f32.mrf.mxu0 }
 0x116   : > { %2216 = vmatprep.mubr.msk.bf16.mxu1 %vm1100_vm4, %v813_v3  ;;  %v1370_v3 = vld [vmem:[%s2982_s18 + $0xa8] sm:$0xff] }
 0x119   : > { %v649_v5 = vpop.permute.xlu1 %648 }
 0x11a   : > { %vm697_vm3 = vcmp.eq.s32.totalorder %v2728_v27, %v649_v5  ;;  %v1390_v5 = vpack.c.bf16 %v1368_v1, %v1367_v63 }
 0x11b   : > { %vm729_vm1 = vmor %vm569_vm0, %vm697_vm3 }
 0x11c   : > { %vm762_vm5 = vmor %vm729_vm1, %vm738_vm8 }
 0x11d   : > { %v794_v6 = vsel %vm762_vm5, 1.0, %v2464_v44  ;;  %vm732_vm0 = vmor %vm572_vm15, %vm700_vm14 }
 0x11e   : > { %v814_v51 = vpack.c.bf16 %v794_v6, %v793_v23  ;;  %v524_v8 = vpop.permute.xlu1 %523  ;;  %vm765_vm3 = vmor %vm732_vm0, %vm738_vm8  ;;  %vm576_vm0 = vcmp.eq.s32.totalorder %v2728_v27, %v542_v24  ;;  %v1391_v23 = vpack.c.bf16 %v1370_v3, %v1369_v2  ;;  %v2165_v6 = vpop.f32.mrf.mxu0 }
 0x11f   : > { %vm570_vm6 = vcmp.eq.s32.totalorder %v2728_v27, %v524_v8  ;;  %v797_v26 = vsel %vm765_vm3, 1.0, %v2464_v44  ;;  %vm704_vm3 = vcmp.eq.s32.totalorder %v2728_v27, %v670_v29  ;;  %v1372_v8 = vld [vmem:[%s2982_s18 + $0xb8] sm:$0xff] }
 0x120   : > { %2217 = vmatmul.mubr.msk.bf16.gmra.mxu1 %vm1100_vm4, %v814_v51  ;;  %v1371_v51 = vld [vmem:[%s2982_s18 + $0xb0] sm:$0xff]  ;;  %v971_v10 = vpop.f32.mrf.mxu0 }
 0x122   : > { %v2168_v7 = vpop.f32.mrf.mxu0 }
 0x123   : > { %v652_v11 = vpop.permute.xlu1 %651 }
 0x124   : > { %vm698_vm7 = vcmp.eq.s32.totalorder %v2728_v27, %v652_v11  ;;  %v1392_v11 = vpack.c.bf16 %v1372_v8, %v1371_v51 }
 0x125   : > { %vm730_vm2 = vmor %vm570_vm6, %vm698_vm7 }
 0x126   : > { %vm763_vm10 = vmor %vm730_vm2, %vm738_vm8 }
 0x127   : > { %v655_v12 = vpop.permute.xlu1 %654  ;;  %v795_v13 = vsel %vm763_vm10, 1.0, %v2464_v44 }
 0x128   : > { %vm699_vm11 = vcmp.eq.s32.totalorder %v2728_v27, %v655_v12 }
 0x129   : > { %vm731_vm12 = vmor %vm571_vm9, %vm699_vm11  ;;  %vm575_vm11 = vcmp.eq.s32.totalorder %v2728_v27, %v539_v18 }
 0x12a   : > { %vm764_vm13 = vmor %vm731_vm12, %vm738_vm8 }
 0x12b   : > { %v796_v9 = vsel %vm764_vm13, 1.0, %v2464_v44 }
 0x12c   : > { %v815_v14 = vpack.c.bf16 %v796_v9, %v795_v13  ;;  %v533_v15 = vpop.permute.xlu1 %532  ;;  %v1373_v9 = vld [vmem:[%s2982_s18 + $0xc0] sm:$0xff] }
 0x12d   : > { %vm573_vm1 = vcmp.eq.s32.totalorder %v2728_v27, %v533_v15 }
 0x12e   : > { %2220 = vmatprep.mubr.msk.bf16.mxu1 %vm1100_vm4, %v815_v14  ;;  %v1374_v14 = vld [vmem:[%s2982_s18 + $0xc8] sm:$0xff] }
 0x12f   : > { %v1393_v15 = vpack.c.bf16 %v1374_v14, %v1373_v9 }
 0x131   : > { %v661_v0 = vpop.permute.xlu1 %660 }
 0x132   : > { %vm701_vm5 = vcmp.eq.s32.totalorder %v2728_v27, %v661_v0  ;;  %v1375_v0 = vld [vmem:[%s2982_s18 + $0xd0] sm:$0xff] }
 0x133   : > { %vm733_vm6 = vmor %vm573_vm1, %vm701_vm5 }
 0x134   : > { %vm766_vm7 = vmor %vm733_vm6, %vm738_vm8 }
 0x135   : > { %v798_v19 = vsel %vm766_vm7, 1.0, %v2464_v44  ;;  %vm736_vm1 = vmor %vm576_vm0, %vm704_vm3 }
 0x136   : > { %v816_v20 = vpack.c.bf16 %v798_v19, %v797_v26  ;;  %v536_v22 = vpop.permute.xlu1 %535  ;;  %vm769_vm5 = vmor %vm736_vm1, %vm738_vm8  ;;  %v1376_v26 = vld [vmem:[%s2982_s18 + $0xd8] sm:$0xff]  ;;  %v984_v19 = vpop.f32.mrf.mxu0 }
 0x137   : > { %vm574_vm2 = vcmp.eq.s32.totalorder %v2728_v27, %v536_v22  ;;  %v801_v37 = vsel %vm769_vm5, 1.0, %v2464_v44 }
 0x138   : > { %2221 = vmatmul.mubr.msk.bf16.gmra.mxu1 %vm1100_vm4, %v816_v20  ;;  %v1394_v20 = vpack.c.bf16 %v1376_v26, %v1375_v0 }
 0x13b   : > { %v664_v25 = vpop.permute.xlu1 %663 }
 0x13c   : > { %vm702_vm9 = vcmp.eq.s32.totalorder %v2728_v27, %v664_v25 }
 0x13d   : > { %vm734_vm10 = vmor %vm574_vm2, %vm702_vm9 }
 0x13e   : > { %vm767_vm12 = vmor %vm734_vm10, %vm738_vm8  ;;  %vm1398_vm10 = vcmask 23552  }
 0x13f   : > { %v667_v28 = vpop.permute.xlu1 %666  ;;  %v799_v30 = vsel %vm767_vm12, 1.0, %v2464_v44 }
 0x140   : > { %vm703_vm13 = vcmp.eq.s32.totalorder %v2728_v27, %v667_v28 }
 0x141   : > { %vm735_vm14 = vmor %vm575_vm11, %vm703_vm13 }
 0x142   : > { %vm768_vm15 = vmor %vm735_vm14, %vm738_vm8 }
 0x143   : > { %v800_v31 = vsel %vm768_vm15, 1.0, %v2464_v44 }
 0x144   : > { %v817_v32 = vpack.c.bf16 %v800_v31, %v799_v30  ;;  %v545_v33 = vpop.permute.xlu1 %544  ;;  %v2169_v31 = vpop.f32.mrf.mxu0 }
 0x145   : > { %vm577_vm6 = vcmp.eq.s32.totalorder %v2728_v27, %v545_v33 }
 0x146   : > { %2224 = vmatprep.mubr.msk.bf16.mxu1 %vm1100_vm4, %v817_v32  ;;  %v987_v36 = vpop.f32.mrf.mxu0 }
 0x149   : > { %v673_v34 = vpop.permute.xlu1 %672 }
 0x14a   : > { %vm705_vm7 = vcmp.eq.s32.totalorder %v2728_v27, %v673_v34  ;;  %v1353_v27 = vld [vmem:[%s2982_s18 + $0x20] sm:$0xff] }
 0x14b   : > { %vm737_vm2 = vmor %vm577_vm6, %vm705_vm7  ;;  %v1383_v45 = vpack.c.bf16 %v1354_v42, %v1353_v27  ;;  %v2172_v42 = vpop.f32.mrf.mxu0 }
 0x14c   : > { %vm770_vm9 = vmor %vm737_vm2, %vm738_vm8 }
 0x14d   : > { %v802_v16 = vsel %vm770_vm9, 1.0, %v2464_v44  ;;  %v1355_v44 = vld [vmem:[%s2982_s18 + $0x30] sm:$0xff]  ;;  %v1000_v48 = vpop.f32.mrf.mxu0 }
 0x14e   : > { %v818_v39 = vpack.c.bf16 %v802_v16, %v801_v37  ;;  %v1384_v49 = vpack.c.bf16 %v1356_v46, %v1355_v44  ;;  %v1379_v46 = vld [vmem:[%s2982_s18 + $0xf0] sm:$0xff] }
 0x14f   : > { %v2173_v52 = vpop.f32.mrf.mxu0 }
 0x150   : > { %2225 = vmatmul.mubr.msk.bf16.gmra.mxu1 %vm1100_vm4, %v818_v39 }
 0x151   : > { %2230 = vmatprep.mubr.msk.bf16.mxu1 %vm1398_vm10, %v1381_v38  ;;  %v1003_v17 = vpop.f32.mrf.mxu0 }
 0x158   : > { %2231 = vmatmul.mubr.msk.bf16.vlgmr.msra.gmra.mxu1 %vm1398_vm10, %v1382_v43  ;;  %v1377_v43 = vld [vmem:[%s2982_s18 + $0xe0] sm:$0xff] }
 0x159   : > { %2234 = vmatprep.mubr.msk.bf16.mxu1 %vm1398_vm10, %v1383_v45  ;;  %v1378_v45 = vld [vmem:[%s2982_s18 + $0xe8] sm:$0xff] }
 0x15a   : > { %v1395_v44 = vpack.c.bf16 %v1378_v45, %v1377_v43 }
 0x160   : > { %2235 = vmatmul.mubr.msk.bf16.gmra.mxu1 %vm1398_vm10, %v1384_v49  ;;  %v1396_v49 = vpack.c.bf16 %v1380_v47, %v1379_v46 }
 0x161   : > { %2238 = vmatprep.mubr.msk.bf16.mxu1 %vm1398_vm10, %v1385_v50 }
 0x168   : > { %2239 = vmatmul.mubr.msk.bf16.gmra.mxu1 %vm1398_vm10, %v1386_v54 }
 0x169   : > { %2242 = vmatprep.mubr.msk.bf16.mxu1 %vm1398_vm10, %v1387_v55 }
 0x170   : > { %2243 = vmatmul.mubr.msk.bf16.gmra.mxu1 %vm1398_vm10, %v1388_v60 }
 0x171   : > { %2246 = vmatprep.mubr.msk.bf16.mxu1 %vm1398_vm10, %v1389_v61  ;;  %v2176_v61 = vpop.f32.mrf.mxu0 }
 0x178   : > { %2247 = vmatmul.mubr.msk.bf16.gmra.mxu1 %vm1398_vm10, %v1390_v5 }
 0x179   : > { %2250 = vmatprep.mubr.msk.bf16.mxu1 %vm1398_vm10, %v1391_v23 }
 0x17f   : > { %v2198_v12 = vpop.f32.mrf.mxu1 }
 0x180   : > { %2251 = vmatmul.mubr.msk.bf16.gmra.mxu1 %vm1398_vm10, %v1392_v11  ;;  %v1199_v29 = vadd.f32 %v2198_v12, %v2164_v62  ;;  %v1016_v62 = vpop.f32.mrf.mxu0 }
 0x181   : > { %v1190_v13 = vpop.f32.mrf.mxu1  ;;  %2254 = vmatprep.mubr.msk.bf16.mxu1 %vm1398_vm10, %v1393_v15 }
 0x182   : > { %v1191_v25 = vadd.f32 %v1190_v13, %v968_v4  ;;  %v2177_v1 = vpop.f32.mrf.mxu0 }
 0x183   : > { %v2199_v18 = vpop.f32.mrf.mxu1 }
 0x184   : > { %v1202_v22 = vadd.f32 %v2199_v18, %v2165_v6  ;;  %v1019_v4 = vpop.f32.mrf.mxu0 }
 0x185   : > { %v1193_v24 = vpop.f32.mrf.mxu1 }
 0x186   : > { %v1194_v28 = vadd.f32 %v1193_v24, %v971_v10  ;;  %v1318_v33 = vpack.c.bf16 %v1202_v22, %v1199_v29  ;;  %v2180_v12 = vpop.f32.mrf.mxu0 }
 0x187   : > { %v2202_v30 = vpop.f32.mrf.mxu1 }
 0x188   : > { %v1317_v32 = vpack.c.bf16 %v1194_v28, %v1191_v25  ;;  %2255 = vmatmul.mubr.msk.bf16.gmra.mxu1 %vm1398_vm10, %v1394_v20  ;;  %v1215_v40 = vadd.f32 %v2202_v30, %v2168_v7  ;;  %v1032_v7 = vpop.f32.mrf.mxu0 }
 0x189   : > { %v1206_v34 = vpop.f32.mrf.mxu1  ;;  %2258 = vmatprep.mubr.msk.bf16.mxu1 %vm1398_vm10, %v1395_v44 }
 0x18a   : > { %2278 = vmatprep.mubr.bf16.mxu0 %v1317_v32  ;;  %v1207_v38 = vadd.f32 %v1206_v34, %v984_v19  ;;  %v2181_v9 = vpop.f32.mrf.mxu0 }
 0x18b   : > { %v2203_v35 = vpop.f32.mrf.mxu1  ;;  %2279 = vmatmul.mubr.bf16.vlgmr.msra.gmra.mxu0 %v1318_v33 }
 0x18c   : > { %v1218_v37 = vadd.f32 %v2203_v35, %v2169_v31  ;;  %v1035_v0 = vpop.f32.mrf.mxu0 }
 0x18d   : > { %v1209_v16 = vpop.f32.mrf.mxu1 }
 0x18e   : > { %v1210_v39 = vadd.f32 %v1209_v16, %v987_v36  ;;  %v1320_v27 = vpack.c.bf16 %v1218_v37, %v1215_v40  ;;  %v2184_v28 = vpop.f32.mrf.mxu0 }
 0x190   : > { %v1319_v41 = vpack.c.bf16 %v1210_v39, %v1207_v38  ;;  %2259 = vmatmul.mubr.msk.bf16.gmra.mxu1 %vm1398_vm10, %v1396_v49  ;;  %v1048_v29 = vpop.f32.mrf.mxu0 }
 0x192   : > { %2282 = vmatprep.mubr.bf16.mxu0 %v1319_v41  ;;  %v2185_v31 = vpop.f32.mrf.mxu0 }
 0x193   : > { %2283 = vmatmul.mubr.bf16.gmra.mxu0 %v1320_v27 }
 0x194   : > { %v1051_v34 = vpop.f32.mrf.mxu0 }
 0x196   : > { %v2188_v41 = vpop.f32.mrf.mxu0 }
 0x198   : > { %v2206_v50 = vpop.f32.mrf.mxu1  ;;  %v1064_v27 = vpop.f32.mrf.mxu0 }
 0x199   : > { %v1231_v58 = vadd.f32 %v2206_v50, %v2172_v42 }
 0x19a   : > { %v1222_v21 = vpop.f32.mrf.mxu1  ;;  %v2189_v43 = vpop.f32.mrf.mxu0 }
 0x19b   : > { %v1223_v56 = vadd.f32 %v1222_v21, %v1000_v48 }
 0x19c   : > { %v2207_v53 = vpop.f32.mrf.mxu1  ;;  %v1067_v46 = vpop.f32.mrf.mxu0 }
 0x19d   : > { %v1234_v54 = vadd.f32 %v2207_v53, %v2173_v52 }
 0x19e   : > { %v1225_v55 = vpop.f32.mrf.mxu1 }
 0x19f   : > { %v1226_v57 = vadd.f32 %v1225_v55, %v1003_v17  ;;  %v1322_v60 = vpack.c.bf16 %v1234_v54, %v1231_v58  ;;  %v2192_v17 = vpop.f32.mrf.mxu0 }
 0x1a1   : > { %v1321_v59 = vpack.c.bf16 %v1226_v57, %v1223_v56  ;;  %v1080_v54 = vpop.f32.mrf.mxu0 }
 0x1a3   : > { %2286 = vmatprep.mubr.bf16.mxu0 %v1321_v59  ;;  %v2193_v56 = vpop.f32.mrf.mxu0 }
 0x1a4   : > { %2287 = vmatmul.mubr.bf16.gmra.mxu0 %v1322_v60 }
 0x1a5   : > { %v1083_v59 = vpop.f32.mrf.mxu0 }
 0x1b0   : > { %v2210_v63 = vpop.f32.mrf.mxu1 }
 0x1b1   : > { %v1247_v8 = vadd.f32 %v2210_v63, %v2176_v61 }
 0x1b2   : > { %v1238_v2 = vpop.f32.mrf.mxu1 }
 0x1b3   : > { %v1239_v6 = vadd.f32 %v1238_v2, %v1016_v62 }
 0x1b4   : > { %v2211_v3 = vpop.f32.mrf.mxu1 }
 0x1b5   : > { %v1250_v5 = vadd.f32 %v2211_v3, %v2177_v1 }
 0x1b6   : > { %v1241_v23 = vpop.f32.mrf.mxu1 }
 0x1b7   : > { %v1242_v51 = vadd.f32 %v1241_v23, %v1019_v4  ;;  %v1324_v11 = vpack.c.bf16 %v1250_v5, %v1247_v8  ;;  %v3047_v8 = vld [vmem:[%s3184_s7] ss:$0 sm:$0xff] }
 0x1b9   : > { %v1323_v10 = vpack.c.bf16 %v1242_v51, %v1239_v6 }
 0x1bb   : > { %2290 = vmatprep.mubr.bf16.mxu0 %v1323_v10 }
 0x1bc   : > { %2291 = vmatmul.mubr.bf16.gmra.mxu0 %v1324_v11 }
 0x1c8   : > { %v2214_v13 = vpop.f32.mrf.mxu1 }
 0x1c9   : > { %v1263_v22 = vadd.f32 %v2214_v13, %v2180_v12 }
 0x1ca   : > { %v1254_v14 = vpop.f32.mrf.mxu1 }
 0x1cb   : > { %v1255_v19 = vadd.f32 %v1254_v14, %v1032_v7 }
 0x1cc   : > { %v2215_v15 = vpop.f32.mrf.mxu1 }
 0x1cd   : > { %v1266_v26 = vadd.f32 %v2215_v15, %v2181_v9 }
 0x1ce   : > { %v1257_v18 = vpop.f32.mrf.mxu1 }
 0x1cf   : > { %v1258_v20 = vadd.f32 %v1257_v18, %v1035_v0  ;;  %v1326_v25 = vpack.c.bf16 %v1266_v26, %v1263_v22 }
 0x1d1   : > { %v1325_v24 = vpack.c.bf16 %v1258_v20, %v1255_v19 }
 0x1d3   : > { %2294 = vmatprep.mubr.bf16.mxu0 %v1325_v24 }
 0x1d4   : > { %2295 = vmatmul.mubr.bf16.gmra.mxu0 %v1326_v25 }
 0x1e0   : > { %v2218_v30 = vpop.f32.mrf.mxu1 }
 0x1e1   : > { %v1279_v38 = vadd.f32 %v2218_v30, %v2184_v28 }
 0x1e2   : > { %v1270_v32 = vpop.f32.mrf.mxu1 }
 0x1e3   : > { %v1271_v37 = vadd.f32 %v1270_v32, %v1048_v29 }
 0x1e4   : > { %v2219_v33 = vpop.f32.mrf.mxu1 }
 0x1e5   : > { %v1282_v35 = vadd.f32 %v2219_v33, %v2185_v31 }
 0x1e6   : > { %v1273_v36 = vpop.f32.mrf.mxu1 }
 0x1e7   : > { %v1274_v16 = vadd.f32 %v1273_v36, %v1051_v34  ;;  %v1328_v40 = vpack.c.bf16 %v1282_v35, %v1279_v38 }
 0x1e9   : > { %v1327_v39 = vpack.c.bf16 %v1274_v16, %v1271_v37 }
 0x1eb   : > { %2298 = vmatprep.mubr.bf16.mxu0 %v1327_v39 }
 0x1ec   : > { %2299 = vmatmul.mubr.bf16.gmra.mxu0 %v1328_v40 }
 0x1f8   : > { %v2222_v42 = vpop.f32.mrf.mxu1 }
 0x1f9   : > { %v1295_v52 = vadd.f32 %v2222_v42, %v2188_v41 }
 0x1fa   : > { %v1286_v45 = vpop.f32.mrf.mxu1 }
 0x1fb   : > { %v1287_v49 = vadd.f32 %v1286_v45, %v1064_v27 }
 0x1fc   : > { %v2223_v44 = vpop.f32.mrf.mxu1 }
 0x1fd   : > { %v1298_v47 = vadd.f32 %v2223_v44, %v2189_v43 }
 0x1fe   : > { %v1289_v48 = vpop.f32.mrf.mxu1 }
 0x1ff   : > { %v1290_v50 = vadd.f32 %v1289_v48, %v1067_v46  ;;  %v1330_v53 = vpack.c.bf16 %v1298_v47, %v1295_v52 }
 0x201   : > { %v1329_v21 = vpack.c.bf16 %v1290_v50, %v1287_v49 }
 0x203   : > { %2302 = vmatprep.mubr.bf16.mxu0 %v1329_v21 }
 0x204   : > { %2303 = vmatmul.mubr.bf16.gmra.mxu0 %v1330_v53 }
 0x210   : > { %v2226_v55 = vpop.f32.mrf.mxu1 }
 0x211   : > { %v1311_v1 = vadd.f32 %v2226_v55, %v2192_v17 }
 0x212   : > { %v1302_v57 = vpop.f32.mrf.mxu1 }
 0x213   : > { %v1303_v62 = vadd.f32 %v1302_v57, %v1080_v54 }
 0x214   : > { %v2227_v58 = vpop.f32.mrf.mxu1 }
 0x215   : > { %v1314_v60 = vadd.f32 %v2227_v58, %v2193_v56 }
 0x216   : > { %v1305_v61 = vpop.f32.mrf.mxu1 }
 0x217   : > { %v1306_v63 = vadd.f32 %v1305_v61, %v1083_v59  ;;  %v1332_v3 = vpack.c.bf16 %v1314_v60, %v1311_v1 }
 0x218   : > { %v2232_v4 = vpop.f32.mrf.mxu1 }
 0x219   : > { %v1331_v2 = vpack.c.bf16 %v1306_v63, %v1303_v62 }
 0x21a   : > { %v1488_v5 = vpop.f32.mrf.mxu1 }
 0x21b   : > { %2306 = vmatprep.mubr.bf16.mxu0 %v1331_v2 }
 0x21c   : > { %2307 = vmatmul.mubr.bf16.gmra.mxu0 %v1332_v3  ;;  %v2233_v23 = vpop.f32.mrf.mxu1 }
 0x21e   : > { %v1491_v6 = vpop.f32.mrf.mxu1 }
 0x220   : > { %v2236_v10 = vpop.f32.mrf.mxu1 }
 0x222   : > { %v1504_v14 = vpop.f32.mrf.mxu1 }
 0x224   : > { %v2237_v22 = vpop.f32.mrf.mxu1 }
 0x226   : > { %v1507_v32 = vpop.f32.mrf.mxu1 }
 0x228   : > { %v2240_v38 = vpop.f32.mrf.mxu1 }
 0x22a   : > { %v1520_v39 = vpop.f32.mrf.mxu1 }
 0x22c   : > { %v2241_v41 = vpop.f32.mrf.mxu1 }
 0x22e   : > { %v1523_v46 = vpop.f32.mrf.mxu1 }
 0x230   : > { %v2244_v53 = vpop.f32.mrf.mxu1 }
 0x232   : > { %v1536_v17 = vpop.f32.mrf.mxu1 }
 0x234   : > { %v2245_v55 = vpop.f32.mrf.mxu1 }
 0x236   : > { %v1539_v61 = vpop.f32.mrf.mxu1 }
 0x24b   : > { %v2280_v51 = vpop.f32.mrf.mxu0 }
 0x24c   : > { %v1706_v11 = vadd.f32 %v2280_v51, %v2232_v4 }
 0x24d   : > { %v1697_v12 = vpop.f32.mrf.mxu0 }
 0x24e   : > { %v1833_v7 = vadd.f32 %v3047_v8, %v1706_v11  ;;  %v1698_v13 = vadd.f32 %v1697_v12, %v1488_v5  ;;  %v2248_v5 = vpop.f32.mrf.mxu1 }
 0x24f   : > { %v2281_v9 = vpop.f32.mrf.mxu0 }
 0x250   : > { %1865 = vst [vmem:[%s3050_s23 + $0x10] sm:$0xff] %v1833_v7  ;;  %v1831_v15 = vadd.f32 %v3047_v8, %v1698_v13  ;;  %v1709_v0 = vadd.f32 %v2281_v9, %v2233_v23  ;;  %v1552_v23 = vpop.f32.mrf.mxu1 }
 0x251   : > { %v1700_v26 = vpop.f32.mrf.mxu0 }
 0x252   : > { %1863 = vst [vmem:[%s3050_s23] sm:$0xff] %v1831_v15  ;;  %v1834_v18 = vadd.f32 %v3047_v8, %v1709_v0  ;;  %v1701_v19 = vadd.f32 %v1700_v26, %v1491_v6  ;;  %v2249_v51 = vpop.f32.mrf.mxu1 }
 0x253   : > { %v2284_v20 = vpop.f32.mrf.mxu0 }
 0x254   : > { %1866 = vst [vmem:[%s3050_s23 + $0x18] sm:$0xff] %v1834_v18  ;;  %v1832_v24 = vadd.f32 %v3047_v8, %v1701_v19  ;;  %v1722_v25 = vadd.f32 %v2284_v20, %v2236_v10  ;;  %v1555_v9 = vpop.f32.mrf.mxu1 }
 0x255   : > { %v1713_v28 = vpop.f32.mrf.mxu0 }
 0x256   : > { %1864 = vst [vmem:[%s3050_s23 + $0x8] sm:$0xff] %v1832_v24  ;;  %v1837_v29 = vadd.f32 %v3047_v8, %v1722_v25  ;;  %v1714_v30 = vadd.f32 %v1713_v28, %v1504_v14  ;;  %v2252_v20 = vpop.f32.mrf.mxu1 }
 0x257   : > { %v2285_v31 = vpop.f32.mrf.mxu0 }
 0x258   : > { %1869 = vst [vmem:[%s3050_s23 + $0x30] sm:$0xff] %v1837_v29  ;;  %v1835_v33 = vadd.f32 %v3047_v8, %v1714_v30  ;;  %v1725_v34 = vadd.f32 %v2285_v31, %v2237_v22  ;;  %v1568_v22 = vpop.f32.mrf.mxu1 }
 0x259   : > { %v1716_v35 = vpop.f32.mrf.mxu0 }
 0x25a   : > { %1867 = vst [vmem:[%s3050_s23 + $0x20] sm:$0xff] %v1835_v33  ;;  %v1838_v36 = vadd.f32 %v3047_v8, %v1725_v34  ;;  %v1717_v37 = vadd.f32 %v1716_v35, %v1507_v32  ;;  %v2253_v25 = vpop.f32.mrf.mxu1 }
 0x25c   : > { %1870 = vst [vmem:[%s3050_s23 + $0x38] sm:$0xff] %v1838_v36  ;;  %v1836_v16 = vadd.f32 %v3047_v8, %v1717_v37  ;;  %v1571_v33 = vpop.f32.mrf.mxu1 }
 0x25e   : > { %1868 = vst [vmem:[%s3050_s23 + $0x28] sm:$0xff] %v1836_v16 }
 0x264   : > { %v2288_v40 = vpop.f32.mrf.mxu0 }
 0x265   : > { %v1738_v27 = vadd.f32 %v2288_v40, %v2240_v38 }
 0x266   : > { %v1729_v42 = vpop.f32.mrf.mxu0 }
 0x267   : > { %v1841_v43 = vadd.f32 %v3047_v8, %v1738_v27  ;;  %v1730_v45 = vadd.f32 %v1729_v42, %v1520_v39  ;;  %v2256_v39 = vpop.f32.mrf.mxu1 }
 0x268   : > { %v2289_v44 = vpop.f32.mrf.mxu0 }
 0x269   : > { %1873 = vst [vmem:[%s3050_s23 + $0x50] sm:$0xff] %v1841_v43  ;;  %v1839_v47 = vadd.f32 %v3047_v8, %v1730_v45  ;;  %v1741_v48 = vadd.f32 %v2289_v44, %v2241_v41  ;;  %v1584_v40 = vpop.f32.mrf.mxu1 }
 0x26a   : > { %v1732_v49 = vpop.f32.mrf.mxu0 }
 0x26b   : > { %1871 = vst [vmem:[%s3050_s23 + $0x40] sm:$0xff] %v1839_v47  ;;  %v1842_v50 = vadd.f32 %v3047_v8, %v1741_v48  ;;  %v1733_v52 = vadd.f32 %v1732_v49, %v1523_v46  ;;  %v2257_v27 = vpop.f32.mrf.mxu1 }
 0x26d   : > { %1874 = vst [vmem:[%s3050_s23 + $0x58] sm:$0xff] %v1842_v50  ;;  %v1840_v21 = vadd.f32 %v3047_v8, %v1733_v52  ;;  %v1587_v47 = vpop.f32.mrf.mxu1 }
 0x26f   : > { %1872 = vst [vmem:[%s3050_s23 + $0x48] sm:$0xff] %v1840_v21 }
 0x27c   : > { %v2292_v54 = vpop.f32.mrf.mxu0 }
 0x27d   : > { %v1754_v56 = vadd.f32 %v2292_v54, %v2244_v53 }
 0x27e   : > { %v1745_v57 = vpop.f32.mrf.mxu0 }
 0x27f   : > { %v1845_v58 = vadd.f32 %v3047_v8, %v1754_v56  ;;  %v1746_v59 = vadd.f32 %v1745_v57, %v1536_v17  ;;  %v2260_v17 = vpop.f32.mrf.mxu1 }
 0x280   : > { %v2293_v60 = vpop.f32.mrf.mxu0 }
 0x281   : > { %1877 = vst [vmem:[%s3050_s23 + $0x70] sm:$0xff] %v1845_v58  ;;  %v1843_v62 = vadd.f32 %v3047_v8, %v1746_v59  ;;  %v1757_v63 = vadd.f32 %v2293_v60, %v2245_v55  ;;  %v1600_v54 = vpop.f32.mrf.mxu1 }
 0x282   : > { %v1748_v1 = vpop.f32.mrf.mxu0 }
 0x283   : > { %1875 = vst [vmem:[%s3050_s23 + $0x60] sm:$0xff] %v1843_v62  ;;  %v1846_v2 = vadd.f32 %v3047_v8, %v1757_v63  ;;  %v1749_v3 = vadd.f32 %v1748_v1, %v1539_v61  ;;  %v2261_v57 = vpop.f32.mrf.mxu1 }
 0x285   : > { %1878 = vst [vmem:[%s3050_s23 + $0x78] sm:$0xff] %v1846_v2  ;;  %v1844_v4 = vadd.f32 %v3047_v8, %v1749_v3  ;;  %v1603_v1 = vpop.f32.mrf.mxu1 }
 0x287   : > { %1876 = vst [vmem:[%s3050_s23 + $0x68] sm:$0xff] %v1844_v4 }
 0x294   : > { %v2296_v6 = vpop.f32.mrf.mxu0 }
 0x295   : > { %v1770_v10 = vadd.f32 %v2296_v6, %v2248_v5 }
 0x296   : > { %v1761_v11 = vpop.f32.mrf.mxu0 }
 0x297   : > { %v1849_v12 = vadd.f32 %v3047_v8, %v1770_v10  ;;  %v1762_v7 = vadd.f32 %v1761_v11, %v1552_v23 }
 0x298   : > { %v2297_v13 = vpop.f32.mrf.mxu0 }
 0x299   : > { %1881 = vst [vmem:[%s3050_s23 + $0x90] sm:$0xff] %v1849_v12  ;;  %v1847_v14 = vadd.f32 %v3047_v8, %v1762_v7  ;;  %v1773_v15 = vadd.f32 %v2297_v13, %v2249_v51 }
 0x29a   : > { %v1764_v0 = vpop.f32.mrf.mxu0 }
 0x29b   : > { %1879 = vst [vmem:[%s3050_s23 + $0x80] sm:$0xff] %v1847_v14  ;;  %v1850_v26 = vadd.f32 %v3047_v8, %v1773_v15  ;;  %v1765_v18 = vadd.f32 %v1764_v0, %v1555_v9 }
 0x29d   : > { %1882 = vst [vmem:[%s3050_s23 + $0x98] sm:$0xff] %v1850_v26  ;;  %v1848_v19 = vadd.f32 %v3047_v8, %v1765_v18 }
 0x29f   : > { %1880 = vst [vmem:[%s3050_s23 + $0x88] sm:$0xff] %v1848_v19 }
 0x2ac   : > { %v2300_v24 = vpop.f32.mrf.mxu0 }
 0x2ad   : > { %v1786_v28 = vadd.f32 %v2300_v24, %v2252_v20 }
 0x2ae   : > { %v1777_v29 = vpop.f32.mrf.mxu0 }
 0x2af   : > { %v1853_v30 = vadd.f32 %v3047_v8, %v1786_v28  ;;  %v1778_v31 = vadd.f32 %v1777_v29, %v1568_v22 }
 0x2b0   : > { %v2301_v32 = vpop.f32.mrf.mxu0 }
 0x2b1   : > { %1885 = vst [vmem:[%s3050_s23 + $0xb0] sm:$0xff] %v1853_v30  ;;  %v1851_v34 = vadd.f32 %v3047_v8, %v1778_v31  ;;  %v1789_v35 = vadd.f32 %v2301_v32, %v2253_v25 }
 0x2b2   : > { %v1780_v36 = vpop.f32.mrf.mxu0 }
 0x2b3   : > { %1883 = vst [vmem:[%s3050_s23 + $0xa0] sm:$0xff] %v1851_v34  ;;  %v1854_v37 = vadd.f32 %v3047_v8, %v1789_v35  ;;  %v1781_v16 = vadd.f32 %v1780_v36, %v1571_v33 }
 0x2b5   : > { %1886 = vst [vmem:[%s3050_s23 + $0xb8] sm:$0xff] %v1854_v37  ;;  %v1852_v38 = vadd.f32 %v3047_v8, %v1781_v16 }
 0x2b7   : > { %1884 = vst [vmem:[%s3050_s23 + $0xa8] sm:$0xff] %v1852_v38 }
 0x2c4   : > { %v2304_v41 = vpop.f32.mrf.mxu0 }
 0x2c5   : > { %v1802_v42 = vadd.f32 %v2304_v41, %v2256_v39 }
 0x2c6   : > { %v1793_v43 = vpop.f32.mrf.mxu0 }
 0x2c7   : > { %v1857_v45 = vadd.f32 %v3047_v8, %v1802_v42  ;;  %v1794_v44 = vadd.f32 %v1793_v43, %v1584_v40 }
 0x2c8   : > { %v2305_v46 = vpop.f32.mrf.mxu0 }
 0x2c9   : > { %1889 = vst [vmem:[%s3050_s23 + $0xd0] sm:$0xff] %v1857_v45  ;;  %v1855_v48 = vadd.f32 %v3047_v8, %v1794_v44  ;;  %v1805_v49 = vadd.f32 %v2305_v46, %v2257_v27 }
 0x2ca   : > { %v1796_v50 = vpop.f32.mrf.mxu0 }
 0x2cb   : > { %1887 = vst [vmem:[%s3050_s23 + $0xc0] sm:$0xff] %v1855_v48  ;;  %v1858_v52 = vadd.f32 %v3047_v8, %v1805_v49  ;;  %v1797_v21 = vadd.f32 %v1796_v50, %v1587_v47 }
 0x2cd   : > { %1890 = vst [vmem:[%s3050_s23 + $0xd8] sm:$0xff] %v1858_v52  ;;  %v1856_v53 = vadd.f32 %v3047_v8, %v1797_v21 }
 0x2cf   : > { %1888 = vst [vmem:[%s3050_s23 + $0xc8] sm:$0xff] %v1856_v53 }
 0x2dc   : > { %v2308_v55 = vpop.f32.mrf.mxu0 }
 0x2dd   : > { %v1818_v56 = vadd.f32 %v2308_v55, %v2260_v17 }
 0x2de   : > { %v1809_v58 = vpop.f32.mrf.mxu0 }
 0x2df   : > { %v1861_v59 = vadd.f32 %v3047_v8, %v1818_v56  ;;  %v1810_v60 = vadd.f32 %v1809_v58, %v1600_v54 }
 0x2e0   : > { %v2309_v61 = vpop.f32.mrf.mxu0 }
 0x2e1   : > { %1893 = vst [vmem:[%s3050_s23 + $0xf0] sm:$0xff] %v1861_v59  ;;  %v1859_v62 = vadd.f32 %v3047_v8, %v1810_v60  ;;  %v1821_v63 = vadd.f32 %v2309_v61, %v2261_v57 }
 0x2e2   : > { %v1812_v2 = vpop.f32.mrf.mxu0 }
 0x2e3   : > { %1891 = vst [vmem:[%s3050_s23 + $0xe0] sm:$0xff] %v1859_v62  ;;  %v1862_v3 = vadd.f32 %v3047_v8, %v1821_v63  ;;  %v1813_v4 = vadd.f32 %v1812_v2, %v1603_v1  ;;  %1902 = sbr.rel (!%p2551_p5) target bundleno = 771 (0x303), region = 56 }
 0x2e5   : > { %1894 = vst [vmem:[%s3050_s23 + $0xf8] sm:$0xff] %v1862_v3  ;;  %v1860_v5 = vadd.f32 %v3047_v8, %v1813_v4 }
 0x2e7   : > { %1892 = vst [vmem:[%s3050_s23 + $0xe8] sm:$0xff] %v1860_v5 }
 0x2e8   : > { %s3199_s25 = smov (!%p1905_p11, %s1904_s25), 32 }
 0x2e9   : > { %s3122_s26 = sshll.u32 %s3199_s25, 7 }
 0x2ea   : > { %s1909_s10 = ssub.s32 4096, %s3122_s26 }
 0x2eb   : > { %1910 = vsyncadd %s3117_s24, %s1909_s10  ;;  %p2075_p12 = scmp.ne.s32.totalorder %s3122_s26, 0  ;;  %s2081_s12 = sshll.u32 %s2534_s9, 12 }
 0x2ec   : > { %s3131_s18 = scalar_lea.hbm %s3185_s8, %s2081_s12  ;;  %s1915_s17 = sshll.u32 %s3050_s23, 4  ;;  %s3134_s17 = int_to_ptr.vmem [resolvable:$true] %s1915_s17 }
 0x2ed   : > { %s2399_s19 = scalar_lea.vmem %s3134_s17, %s3122_s26  ;;  %s2465_s20 = smov [#allocation2]  }
 0x2ee   : > { %p2400_p13 = scmp.ne.s32.totalorder %s3134_s17, %s2399_s19  ;;  %s2403_s21 = sshll.u32 %s2465_s20, 4  ;;  %s2404_s21 = int_to_ptr.vmem [resolvable:$false] %s2403_s21 }
 0x2ef   : > { %s2405_s9 = scalar_lea.vmem %s2404_s21, 8192  ;;  %p2406_p2 = scmp.lt.s32.totalorder %s3134_s17, %s2404_s21 }
 0x2f0   : > { %p2401_p0 = pnand %p2400_p13, %p2075_p12  ;;  %p2407_p3 = scmp.lt.s32.totalorder %s2405_s9, %s2399_s19 }
 0x2f2   : > { %p2402_p1 = pneg %p2401_p0  ;;  %p2408_p4 = por %p2407_p3, %p2406_p2 }
 0x2f4   : > { %p2409_p5 = pnand %p2408_p4, %p2402_p1 }
 0x2f6   : > { %2412 = shalt.err (!%p2409_p5)
}
 0x2f7   : > { %s2413_s22 = scalar_lea.hbm %s3131_s18, %s3122_s26  ;;  %s2417_s10 = scalar_lea.hbm %s3185_s8, 16000 }
 0x2f8   : > { %p2414_p7 = scmp.ne.s32.totalorder %s3131_s18, %s2413_s22  ;;  %p2418_p10 = scmp.lt.s32.totalorder %s3131_s18, %s3185_s8 }
 0x2f9   : > { %p2419_p11 = scmp.lt.s32.totalorder %s2417_s10, %s2413_s22 }
 0x2fa   : > { %p2415_p8 = pnand %p2414_p7, %p2075_p12 }
 0x2fb   : > { %p2420_p13 = por %p2419_p11, %p2418_p10 }
 0x2fc   : > { %p2416_p9 = pneg %p2415_p8 }
 0x2fe   : > { %p2421_p0 = pnand %p2420_p13, %p2416_p9 }
 0x300   : > { %2424 = shalt.err (!%p2421_p0)
}
 0x301   : > { %s2466_s15 = smov 128   ;;  %s2467_s19 = smov 8  }
 0x302   : > { %1921 = dma.vmem_to_hbm [thread:$0]  (%p2075_p12), %s3134_s17, %s3122_s26, %s3131_s18, %s3117_s24, %s2466_s15, %s2466_s15, %s2467_s19  }
 0x303 PF: > { %p2315_p1 = scmp.ge.s32.totalorder %s2459_s30, 2  ;;  %s1930_s20 = sand.u32 1, %s2447_s27  }
 0x304   : > { %s1931_s21 = scalar_lea.sflag [#allocation3], %s1930_s20 }
 0x305   : > { %p2312_p2 = pnand %p2315_p1, %p2555_p6 }
 0x307   : > { %p2313_p3 = pneg %p2312_p2 }
 0x309   : > { %2442 = dma.done.wait (%p2313_p3), %s1931_s21, 4096  }
 0x30a   : > { %2444 = vsyncadd (%p2313_p3), %s1931_s21, 4294963200  ;;  %p18_p4 = scmp.ge.s32.totalorder %s2538_s11, 6   ;;  %s3194_s27 = smov %s2451_s28 }
 0x30b   : > { %s3195_s28 = smov %s2455_s29  ;;  %s3196_s29 = smov %s2549_s14 }
 0x30c   : > { %s3197_s30 = smov %s2538_s11  ;;  %20 = sbr.rel (!%p18_p4) target bundleno = 3 (0x3), region = 93 }
 0x311   :  { %1936 = vsyncpa [#allocation3], 1 }
 0x312   :  { %1938 = vsyncpa [#allocation3 + $0x1], 1 }

</bundles_post_ra>
